<compile_context>
chip_gen: v7x
topology: tpu7x:2x2x1
jax: 0.10.0
libtpu: 0.0.40
codegen_flags: <defaults>
</compile_context>

<pallas_src>
import functools
import math

import jax
import jax.numpy as jnp
from jax.experimental import pallas as pl
from jax.experimental.pallas import tpu as pltpu


def _point_loss_kernel(points_ref, labels_ref, yp_ref, yt_ref, out_ref, mask_ref,
                       *, radius, num_classes, row_tile, num_points):
    """Grid = (batch, row_tiles); one invocation handles one (1, C, TH, W) tile.

    points_ref / labels_ref are SMEM scalar-prefetch refs (flattened), yp_ref /
    yt_ref are VMEM tiles, out_ref is this step's private (1,1,1,1) partial sum,
    mask_ref is a (TH, W) VMEM scratch accumulator.
    """
    b = pl.program_id(0)
    t = pl.program_id(1)

    sigma = float(radius // 3)
    half = radius // 2
    k_gauss = 0.5 / (sigma * sigma)                       # gaussian = exp(-k*(di^2+dj^2))
    const_lse = math.log(math.e + (num_classes - 1))      # logsumexp of a one-hot row

    C = num_classes
    L = num_points
    TH = yp_ref.shape[2]
    W = yp_ref.shape[3]
    row0 = t * row_tile                                   # first global row of this tile

    # ---- scalar point data (SMEM reads) -------------------------------------
    i_ps = [points_ref[b, 2 * l] for l in range(L)]
    j_ps = [points_ref[b, 2 * l + 1] for l in range(L)]
    lbls = [labels_ref[b, l] for l in range(L)]
    # Does point l's row window [i_p - half, i_p + half] touch this row tile?
    hits = [(i_ps[l] + half >= row0) & (i_ps[l] - half < row0 + TH) for l in range(L)]
    any_hit = hits[0]
    for l in range(1, L):
        any_hit = any_hit | hits[l]

    out_ref[...] = jnp.zeros_like(out_ref)

    @pl.when(any_hit)                                     # tile with no point window -> 0
    def _():
        yt = yt_ref[0, 0]                                 # (TH, W) int32 class ids

        # ---- streaming softmax over channels, keeping only p[y_true] --------
        m = yp_ref[0, 0]
        for c in range(1, C):
            m = jnp.maximum(m, yp_ref[0, c])
        s = jnp.zeros((TH, W), jnp.float32)
        e_sel = jnp.zeros((TH, W), jnp.float32)
        for c in range(C):
            e_c = jnp.exp(yp_ref[0, c] - m)
            s = s + e_c
            e_sel = jnp.where(yt == c, e_c, e_sel)
        p_sel = e_sel / s                                  # exact divide: stays in f32 tol
        # Closed-form soft-target CE with one-hot logits (exact identity).
        loss_px = const_lse - p_sel                        # (TH, W)

        # ---- gaussian point mask (separable, sqrt-free) ----------------------
        ii = jax.lax.broadcasted_iota(jnp.int32, (TH, 1), 0) + row0   # global row idx
        jj = jax.lax.broadcasted_iota(jnp.int32, (1, W), 1)           # global col idx

        mask_ref[...] = jnp.zeros_like(mask_ref)
        for l in range(L):
            i_p, j_p, lbl = i_ps[l], j_ps[l], lbls[l]

            def _add(i_p=i_p, j_p=j_p, lbl=lbl):
                di = (ii - i_p).astype(jnp.float32)                    # (TH, 1)
                dj = (jj - j_p).astype(jnp.float32)                    # (1, W)
                in_i = (ii >= i_p - half) & (ii < i_p + 1 + half)      # (TH, 1)
                # j window intentionally asymmetric (no +1), exactly as in the ref.
                in_j = (jj >= j_p - half) & (jj < j_p + half)          # (1, W)
                gi = jnp.where(in_i, jnp.exp(di * di * (-k_gauss)), 0.0)
                gj = jnp.where(in_j, jnp.exp(dj * dj * (-k_gauss)), 0.0)
                g2d = gi * gj                                          # (TH, W) broadcast
                mask_ref[...] += jnp.where(yt == lbl, g2d, 0.0)

            pl.when(hits[l])(_add)                                     # skip non-touching points

        out_ref[...] = jnp.sum(loss_px * mask_ref[...]).reshape(out_ref.shape)


def _pick_row_tile(H, C, W, budget_bytes=2 << 20):
    """Largest row tile that divides H, is a multiple of 8 (or == H), and keeps the
    y_pred block within ~budget_bytes so double-buffering fits VMEM on all gens."""
    if H % 8 != 0:
        return H                       # full-dim block is always legal
    cands = [th for th in range(8, H + 1, 8) if H % th == 0]
    within = [th for th in cands if C * th * W * 4 <= budget_bytes]
    return max(within) if within else min(cands)


def point_loss(y_pred, y_true, points, point_labels, radius, *, row_tile=None):
    B, C, H, W = y_pred.shape
    L = points.shape[1]
    if radius < 3:
        raise ValueError("radius must be >= 3 (sigma = radius // 3 would be 0).")

    if row_tile is None:
        row_tile = _pick_row_tile(H, C, W)
    assert H % row_tile == 0
    n_tiles = H // row_tile

    # Flatten point data: SMEM pads the last dim, so keep it 1-D-ish per batch row.
    points_flat = points.reshape(B, 2 * L).astype(jnp.int32)
    labels_flat = point_labels.reshape(B, L).astype(jnp.int32)

    kernel = functools.partial(
        _point_loss_kernel, radius=radius, num_classes=C,
        row_tile=row_tile, num_points=L)

    partials = pl.pallas_call(
        kernel,
        out_shape=jax.ShapeDtypeStruct((B, n_tiles, 1, 1), jnp.float32),
        grid_spec=pltpu.PrefetchScalarGridSpec(
            num_scalar_prefetch=2,                        # points, labels -> SMEM
            grid=(B, n_tiles),
            in_specs=[
                pl.BlockSpec((1, C, row_tile, W), lambda b, t, pts, lbls: (b, 0, t, 0)),
                pl.BlockSpec((1, 1, row_tile, W), lambda b, t, pts, lbls: (b, 0, t, 0)),
            ],
            out_specs=pl.BlockSpec((1, 1, 1, 1), lambda b, t, pts, lbls: (b, t, 0, 0)),
            scratch_shapes=[pltpu.VMEM((row_tile, W), jnp.float32)],
        ),
        compiler_params=pltpu.CompilerParams(
            # Every grid step writes its own partial-sum block -> fully parallel
            # (lets v7x shard across both TensorCores; harmless on v5e/v6e).
            dimension_semantics=("parallel", "parallel")),
    )(points_flat, labels_flat,
      # On bandwidth-bound v5e/v6e, y_pred could be fed as bf16 and cast in-kernel;
      # kept f32 here to match the f32 reference within tight tolerance.
      y_pred.astype(jnp.float32), y_true.astype(jnp.int32))

    return jnp.sum(partials) * (1.0 / float(B * H * W))


def point_loss_ref(y_pred, y_true, points, point_labels, radius):
    """Pure-JAX reference mirroring the PyTorch code (for correctness check)."""
    B, C, H, W = y_pred.shape
    sigma = float(radius // 3)
    half = radius // 2
    p = jax.nn.softmax(y_pred, axis=1)
    onehot = jax.nn.one_hot(y_true[:, 0], C, axis=1)          # (B, C, H, W)
    log_sm = jax.nn.log_softmax(onehot, axis=1)
    loss = -(p * log_sm).sum(axis=1)                          # (B, H, W)
    ii = jnp.arange(H)[:, None]
    jj = jnp.arange(W)[None, :]
    mask = jnp.zeros((B, H, W), jnp.float32)
    for b in range(B):
        for l in range(points.shape[1]):
            i_p = points[b, l, 0]
            j_p = points[b, l, 1]
            lbl = point_labels[b, l, 0]
            in_i = (ii >= i_p - half) & (ii < i_p + 1 + half)
            in_j = (jj >= j_p - half) & (jj < j_p + half)
            match = y_true[b, 0] == lbl
            d = jnp.sqrt(((ii - i_p) ** 2 + (jj - j_p) ** 2).astype(jnp.float32))
            g = jnp.exp(-0.5 * (d / sigma) ** 2)
            mask = mask.at[b].add(jnp.where(in_i & in_j & match, g, 0.0))
    return jnp.mean(loss * mask)


if __name__ == "__main__":
    B, C, H, W, L = 2, 3, 16, 16, 8
    radius = 9

    key = jax.random.PRNGKey(0)
    k1, k2, k3, k4 = jax.random.split(key, 4)
    y_pred = jax.random.normal(k1, (B, C, H, W), dtype=jnp.float32)
    y_true = jax.random.randint(k2, (B, 1, H, W), 0, C, dtype=jnp.int32)
    points = jax.random.randint(k3, (B, L, 2), 0, H, dtype=jnp.int32)
    point_labels = jax.random.randint(k4, (B, L, 1), 0, C, dtype=jnp.int32)

    ref = point_loss_ref(y_pred, y_true, points, point_labels, radius)

    # Auto row tile (== H for this small shape) plus an explicit 2-tile split to
    # exercise the tiled path (row-iota offset + pl.when window gating).
    out_auto = jax.block_until_ready(
        point_loss(y_pred, y_true, points, point_labels, radius))
    out_tiled = jax.block_until_ready(
        point_loss(y_pred, y_true, points, point_labels, radius, row_tile=8))

    assert jnp.allclose(out_auto, ref, rtol=1e-4, atol=1e-5), (out_auto, ref)
    assert jnp.allclose(out_tiled, ref, rtol=1e-4, atol=1e-5), (out_tiled, ref)

    print("KERNEL_OK")
</pallas_src>

<mosaic_0001>
module attributes {stable_mosaic.version = 11 : i64} {
  func.func @_point_loss_kernel(%arg0: i32, %arg1: i32, %arg2: memref<2x16xi32, #tpu.memory_space<smem>>, %arg3: memref<2x8xi32, #tpu.memory_space<smem>>, %arg4: memref<1x3x16x16xf32, #tpu.memory_space<vmem>>, %arg5: memref<1x1x16x16xi32, #tpu.memory_space<vmem>>, %arg6: memref<1x1x1x1xf32, #tpu.memory_space<vmem>>, %arg7: memref<16x16xf32, #tpu.memory_space<vmem>>) attributes {dimension_semantics = [#tpu.dimension_semantics<parallel>, #tpu.dimension_semantics<parallel>], iteration_bounds = array<i64: 2, 1>, scalar_prefetch = 2 : i64, scratch_operands = 1 : i64, tpu.core_type = #tpu.core_type<tc>, window_params = [{transform_indices = @transform_0, window_bounds = array<i64: 1, 3, 16, 16>}, {transform_indices = @transform_1, window_bounds = array<i64: 1, 1, 16, 16>}, {transform_indices = @transform_2, window_bounds = array<i64: 1, 1, 1, 1>}]} {
    %c16_i32 = arith.constant 16 : i32
    %0 = arith.muli %arg1, %c16_i32 : i32
    %1 = arith.index_cast %arg0 : i32 to index
    %c0 = arith.constant 0 : index
    %2 = memref.load %arg2[%1, %c0] : memref<2x16xi32, #tpu.memory_space<smem>>
    %3 = arith.index_cast %arg0 : i32 to index
    %c2 = arith.constant 2 : index
    %4 = memref.load %arg2[%3, %c2] : memref<2x16xi32, #tpu.memory_space<smem>>
    %5 = arith.index_cast %arg0 : i32 to index
    %c4 = arith.constant 4 : index
    %6 = memref.load %arg2[%5, %c4] : memref<2x16xi32, #tpu.memory_space<smem>>
    %7 = arith.index_cast %arg0 : i32 to index
    %c6 = arith.constant 6 : index
    %8 = memref.load %arg2[%7, %c6] : memref<2x16xi32, #tpu.memory_space<smem>>
    %9 = arith.index_cast %arg0 : i32 to index
    %c8 = arith.constant 8 : index
    %10 = memref.load %arg2[%9, %c8] : memref<2x16xi32, #tpu.memory_space<smem>>
    %11 = arith.index_cast %arg0 : i32 to index
    %c10 = arith.constant 10 : index
    %12 = memref.load %arg2[%11, %c10] : memref<2x16xi32, #tpu.memory_space<smem>>
    %13 = arith.index_cast %arg0 : i32 to index
    %c12 = arith.constant 12 : index
    %14 = memref.load %arg2[%13, %c12] : memref<2x16xi32, #tpu.memory_space<smem>>
    %15 = arith.index_cast %arg0 : i32 to index
    %c14 = arith.constant 14 : index
    %16 = memref.load %arg2[%15, %c14] : memref<2x16xi32, #tpu.memory_space<smem>>
    %17 = arith.index_cast %arg0 : i32 to index
    %c1 = arith.constant 1 : index
    %18 = memref.load %arg2[%17, %c1] : memref<2x16xi32, #tpu.memory_space<smem>>
    %19 = arith.index_cast %arg0 : i32 to index
    %c3 = arith.constant 3 : index
    %20 = memref.load %arg2[%19, %c3] : memref<2x16xi32, #tpu.memory_space<smem>>
    %21 = arith.index_cast %arg0 : i32 to index
    %c5 = arith.constant 5 : index
    %22 = memref.load %arg2[%21, %c5] : memref<2x16xi32, #tpu.memory_space<smem>>
    %23 = arith.index_cast %arg0 : i32 to index
    %c7 = arith.constant 7 : index
    %24 = memref.load %arg2[%23, %c7] : memref<2x16xi32, #tpu.memory_space<smem>>
    %25 = arith.index_cast %arg0 : i32 to index
    %c9 = arith.constant 9 : index
    %26 = memref.load %arg2[%25, %c9] : memref<2x16xi32, #tpu.memory_space<smem>>
    %27 = arith.index_cast %arg0 : i32 to index
    %c11 = arith.constant 11 : index
    %28 = memref.load %arg2[%27, %c11] : memref<2x16xi32, #tpu.memory_space<smem>>
    %29 = arith.index_cast %arg0 : i32 to index
    %c13 = arith.constant 13 : index
    %30 = memref.load %arg2[%29, %c13] : memref<2x16xi32, #tpu.memory_space<smem>>
    %31 = arith.index_cast %arg0 : i32 to index
    %c15 = arith.constant 15 : index
    %32 = memref.load %arg2[%31, %c15] : memref<2x16xi32, #tpu.memory_space<smem>>
    %33 = arith.index_cast %arg0 : i32 to index
    %c0_0 = arith.constant 0 : index
    %34 = memref.load %arg3[%33, %c0_0] : memref<2x8xi32, #tpu.memory_space<smem>>
    %35 = arith.index_cast %arg0 : i32 to index
    %c1_1 = arith.constant 1 : index
    %36 = memref.load %arg3[%35, %c1_1] : memref<2x8xi32, #tpu.memory_space<smem>>
    %37 = arith.index_cast %arg0 : i32 to index
    %c2_2 = arith.constant 2 : index
    %38 = memref.load %arg3[%37, %c2_2] : memref<2x8xi32, #tpu.memory_space<smem>>
    %39 = arith.index_cast %arg0 : i32 to index
    %c3_3 = arith.constant 3 : index
    %40 = memref.load %arg3[%39, %c3_3] : memref<2x8xi32, #tpu.memory_space<smem>>
    %41 = arith.index_cast %arg0 : i32 to index
    %c4_4 = arith.constant 4 : index
    %42 = memref.load %arg3[%41, %c4_4] : memref<2x8xi32, #tpu.memory_space<smem>>
    %43 = arith.index_cast %arg0 : i32 to index
    %c5_5 = arith.constant 5 : index
    %44 = memref.load %arg3[%43, %c5_5] : memref<2x8xi32, #tpu.memory_space<smem>>
    %45 = arith.index_cast %arg0 : i32 to index
    %c6_6 = arith.constant 6 : index
    %46 = memref.load %arg3[%45, %c6_6] : memref<2x8xi32, #tpu.memory_space<smem>>
    %47 = arith.index_cast %arg0 : i32 to index
    %c7_7 = arith.constant 7 : index
    %48 = memref.load %arg3[%47, %c7_7] : memref<2x8xi32, #tpu.memory_space<smem>>
    %c4_i32 = arith.constant 4 : i32
    %49 = arith.addi %2, %c4_i32 : i32
    %50 = arith.cmpi sge, %49, %0 : i32
    %c4_i32_8 = arith.constant 4 : i32
    %51 = arith.subi %2, %c4_i32_8 : i32
    %c16_i32_9 = arith.constant 16 : i32
    %52 = arith.addi %0, %c16_i32_9 : i32
    %53 = arith.cmpi slt, %51, %52 : i32
    %54 = arith.andi %50, %53 : i1
    %c4_i32_10 = arith.constant 4 : i32
    %55 = arith.addi %4, %c4_i32_10 : i32
    %56 = arith.cmpi sge, %55, %0 : i32
    %c4_i32_11 = arith.constant 4 : i32
    %57 = arith.subi %4, %c4_i32_11 : i32
    %c16_i32_12 = arith.constant 16 : i32
    %58 = arith.addi %0, %c16_i32_12 : i32
    %59 = arith.cmpi slt, %57, %58 : i32
    %60 = arith.andi %56, %59 : i1
    %c4_i32_13 = arith.constant 4 : i32
    %61 = arith.addi %6, %c4_i32_13 : i32
    %62 = arith.cmpi sge, %61, %0 : i32
    %c4_i32_14 = arith.constant 4 : i32
    %63 = arith.subi %6, %c4_i32_14 : i32
    %c16_i32_15 = arith.constant 16 : i32
    %64 = arith.addi %0, %c16_i32_15 : i32
    %65 = arith.cmpi slt, %63, %64 : i32
    %66 = arith.andi %62, %65 : i1
    %c4_i32_16 = arith.constant 4 : i32
    %67 = arith.addi %8, %c4_i32_16 : i32
    %68 = arith.cmpi sge, %67, %0 : i32
    %c4_i32_17 = arith.constant 4 : i32
    %69 = arith.subi %8, %c4_i32_17 : i32
    %c16_i32_18 = arith.constant 16 : i32
    %70 = arith.addi %0, %c16_i32_18 : i32
    %71 = arith.cmpi slt, %69, %70 : i32
    %72 = arith.andi %68, %71 : i1
    %c4_i32_19 = arith.constant 4 : i32
    %73 = arith.addi %10, %c4_i32_19 : i32
    %74 = arith.cmpi sge, %73, %0 : i32
    %c4_i32_20 = arith.constant 4 : i32
    %75 = arith.subi %10, %c4_i32_20 : i32
    %c16_i32_21 = arith.constant 16 : i32
    %76 = arith.addi %0, %c16_i32_21 : i32
    %77 = arith.cmpi slt, %75, %76 : i32
    %78 = arith.andi %74, %77 : i1
    %c4_i32_22 = arith.constant 4 : i32
    %79 = arith.addi %12, %c4_i32_22 : i32
    %80 = arith.cmpi sge, %79, %0 : i32
    %c4_i32_23 = arith.constant 4 : i32
    %81 = arith.subi %12, %c4_i32_23 : i32
    %c16_i32_24 = arith.constant 16 : i32
    %82 = arith.addi %0, %c16_i32_24 : i32
    %83 = arith.cmpi slt, %81, %82 : i32
    %84 = arith.andi %80, %83 : i1
    %c4_i32_25 = arith.constant 4 : i32
    %85 = arith.addi %14, %c4_i32_25 : i32
    %86 = arith.cmpi sge, %85, %0 : i32
    %c4_i32_26 = arith.constant 4 : i32
    %87 = arith.subi %14, %c4_i32_26 : i32
    %c16_i32_27 = arith.constant 16 : i32
    %88 = arith.addi %0, %c16_i32_27 : i32
    %89 = arith.cmpi slt, %87, %88 : i32
    %90 = arith.andi %86, %89 : i1
    %c4_i32_28 = arith.constant 4 : i32
    %91 = arith.addi %16, %c4_i32_28 : i32
    %92 = arith.cmpi sge, %91, %0 : i32
    %c4_i32_29 = arith.constant 4 : i32
    %93 = arith.subi %16, %c4_i32_29 : i32
    %c16_i32_30 = arith.constant 16 : i32
    %94 = arith.addi %0, %c16_i32_30 : i32
    %95 = arith.cmpi slt, %93, %94 : i32
    %96 = arith.andi %92, %95 : i1
    %97 = arith.ori %54, %60 : i1
    %98 = arith.ori %97, %66 : i1
    %99 = arith.ori %98, %72 : i1
    %100 = arith.ori %99, %78 : i1
    %101 = arith.ori %100, %84 : i1
    %102 = arith.ori %101, %90 : i1
    %103 = arith.ori %102, %96 : i1
    %cst = arith.constant 0.000000e+00 : f32
    %104 = vector.broadcast %cst : f32 to vector<1x1x1x1xf32>
    %c0_31 = arith.constant 0 : index
    %c0_32 = arith.constant 0 : index
    %c0_33 = arith.constant 0 : index
    %c0_34 = arith.constant 0 : index
    %105 = vector.load %arg6[%c0_31, %c0_32, %c0_33, %c0_34] : memref<1x1x1x1xf32, #tpu.memory_space<vmem>>, vector<1x1x1x1xf32>
    tpu.vector_store %arg6[%c0_31, %c0_32, %c0_33, %c0_34], %104 {strides = array<i32>} : memref<1x1x1x1xf32, #tpu.memory_space<vmem>>, vector<1x1x1x1xf32>,
    %106 = arith.extui %103 : i1 to i32
    %c0_i32 = arith.constant 0 : i32
    %107 = arith.cmpi ne, %106, %c0_i32 : i32
    scf.if %107 {
      %c0_35 = arith.constant 0 : index
      %c0_36 = arith.constant 0 : index
      %c0_37 = arith.constant 0 : index
      %c0_38 = arith.constant 0 : index
      %108 = vector.load %arg5[%c0_35, %c0_36, %c0_37, %c0_38] : memref<1x1x16x16xi32, #tpu.memory_space<vmem>>, vector<1x1x16x16xi32>
      %109 = vector.shape_cast %108 : vector<1x1x16x16xi32> to vector<16x16xi32>
      %c0_39 = arith.constant 0 : index
      %c0_40 = arith.constant 0 : index
      %c0_41 = arith.constant 0 : index
      %c0_42 = arith.constant 0 : index
      %110 = vector.load %arg4[%c0_39, %c0_40, %c0_41, %c0_42] : memref<1x3x16x16xf32, #tpu.memory_space<vmem>>, vector<1x1x16x16xf32>
      %111 = vector.shape_cast %110 : vector<1x1x16x16xf32> to vector<16x16xf32>
      %c0_43 = arith.constant 0 : index
      %c1_44 = arith.constant 1 : index
      %c0_45 = arith.constant 0 : index
      %c0_46 = arith.constant 0 : index
      %112 = vector.load %arg4[%c0_43, %c1_44, %c0_45, %c0_46] : memref<1x3x16x16xf32, #tpu.memory_space<vmem>>, vector<1x1x16x16xf32>
      %113 = vector.shape_cast %112 : vector<1x1x16x16xf32> to vector<16x16xf32>
      %114 = arith.maximumf %111, %113 : vector<16x16xf32>
      %c0_47 = arith.constant 0 : index
      %c2_48 = arith.constant 2 : index
      %c0_49 = arith.constant 0 : index
      %c0_50 = arith.constant 0 : index
      %115 = vector.load %arg4[%c0_47, %c2_48, %c0_49, %c0_50] : memref<1x3x16x16xf32, #tpu.memory_space<vmem>>, vector<1x1x16x16xf32>
      %116 = vector.shape_cast %115 : vector<1x1x16x16xf32> to vector<16x16xf32>
      %117 = arith.maximumf %114, %116 : vector<16x16xf32>
      %cst_51 = arith.constant 0.000000e+00 : f32
      %118 = vector.broadcast %cst_51 : f32 to vector<16x16xf32>
      %cst_52 = arith.constant 0.000000e+00 : f32
      %119 = vector.broadcast %cst_52 : f32 to vector<16x16xf32>
      %c0_53 = arith.constant 0 : index
      %c0_54 = arith.constant 0 : index
      %c0_55 = arith.constant 0 : index
      %c0_56 = arith.constant 0 : index
      %120 = vector.load %arg4[%c0_53, %c0_54, %c0_55, %c0_56] : memref<1x3x16x16xf32, #tpu.memory_space<vmem>>, vector<1x1x16x16xf32>
      %121 = vector.shape_cast %120 : vector<1x1x16x16xf32> to vector<16x16xf32>
      %122 = arith.subf %121, %117 : vector<16x16xf32>
      %123 = math.exp %122 : vector<16x16xf32>
      %124 = arith.addf %118, %123 : vector<16x16xf32>
      %c0_i32_57 = arith.constant 0 : i32
      %125 = vector.broadcast %c0_i32_57 : i32 to vector<16x16xi32>
      %126 = arith.cmpi eq, %109, %125 : vector<16x16xi32>
      %127 = arith.select %126, %123, %119 : vector<16x16xi1>, vector<16x16xf32>
      %c0_58 = arith.constant 0 : index
      %c1_59 = arith.constant 1 : index
      %c0_60 = arith.constant 0 : index
      %c0_61 = arith.constant 0 : index
      %128 = vector.load %arg4[%c0_58, %c1_59, %c0_60, %c0_61] : memref<1x3x16x16xf32, #tpu.memory_space<vmem>>, vector<1x1x16x16xf32>
      %129 = vector.shape_cast %128 : vector<1x1x16x16xf32> to vector<16x16xf32>
      %130 = arith.subf %129, %117 : vector<16x16xf32>
      %131 = math.exp %130 : vector<16x16xf32>
      %132 = arith.addf %124, %131 : vector<16x16xf32>
      %c1_i32 = arith.constant 1 : i32
      %133 = vector.broadcast %c1_i32 : i32 to vector<16x16xi32>
      %134 = arith.cmpi eq, %109, %133 : vector<16x16xi32>
      %135 = arith.select %134, %131, %127 : vector<16x16xi1>, vector<16x16xf32>
      %c0_62 = arith.constant 0 : index
      %c2_63 = arith.constant 2 : index
      %c0_64 = arith.constant 0 : index
      %c0_65 = arith.constant 0 : index
      %136 = vector.load %arg4[%c0_62, %c2_63, %c0_64, %c0_65] : memref<1x3x16x16xf32, #tpu.memory_space<vmem>>, vector<1x1x16x16xf32>
      %137 = vector.shape_cast %136 : vector<1x1x16x16xf32> to vector<16x16xf32>
      %138 = arith.subf %137, %117 : vector<16x16xf32>
      %139 = math.exp %138 : vector<16x16xf32>
      %140 = arith.addf %132, %139 : vector<16x16xf32>
      %c2_i32 = arith.constant 2 : i32
      %141 = vector.broadcast %c2_i32 : i32 to vector<16x16xi32>
      %142 = arith.cmpi eq, %109, %141 : vector<16x16xi32>
      %143 = arith.select %142, %139, %135 : vector<16x16xi1>, vector<16x16xf32>
      %144 = arith.divf %143, %140 : vector<16x16xf32>
      %cst_66 = arith.constant 1.55144477 : f32
      %145 = vector.broadcast %cst_66 : f32 to vector<16x16xf32>
      %146 = arith.subf %145, %144 : vector<16x16xf32>
      %147 = tpu.iota {dimensions = array<i32: 0>} : vector<16x1xi32>
      %148 = vector.broadcast %0 : i32 to vector<16x1xi32>
      %149 = arith.addi %147, %148 : vector<16x1xi32>
      %150 = tpu.iota {dimensions = array<i32: 1>} : vector<1x16xi32>
      %cst_67 = arith.constant 0.000000e+00 : f32
      %151 = vector.broadcast %cst_67 : f32 to vector<16x16xf32>
      %c0_68 = arith.constant 0 : index
      %c0_69 = arith.constant 0 : index
      %152 = vector.load %arg7[%c0_68, %c0_69] : memref<16x16xf32, #tpu.memory_space<vmem>>, vector<16x16xf32>
      tpu.vector_store %arg7[%c0_68, %c0_69], %151 {strides = array<i32>} : memref<16x16xf32, #tpu.memory_space<vmem>>, vector<16x16xf32>,
      %153 = arith.extui %54 : i1 to i32
      %c0_i32_70 = arith.constant 0 : i32
      %154 = arith.cmpi ne, %153, %c0_i32_70 : i32
      scf.if %154 {
        %177 = vector.broadcast %2 : i32 to vector<16x1xi32>
        %178 = arith.subi %149, %177 : vector<16x1xi32>
        %179 = arith.sitofp %178 : vector<16x1xi32> to vector<16x1xf32>
        %180 = vector.broadcast %18 : i32 to vector<1x16xi32>
        %181 = arith.subi %150, %180 : vector<1x16xi32>
        %182 = arith.sitofp %181 : vector<1x16xi32> to vector<1x16xf32>
        %c4_i32_85 = arith.constant 4 : i32
        %183 = arith.subi %2, %c4_i32_85 : i32
        %184 = vector.broadcast %183 : i32 to vector<16x1xi32>
        %185 = arith.cmpi sge, %149, %184 : vector<16x1xi32>
        %c1_i32_86 = arith.constant 1 : i32
        %186 = arith.addi %2, %c1_i32_86 : i32
        %c4_i32_87 = arith.constant 4 : i32
        %187 = arith.addi %186, %c4_i32_87 : i32
        %188 = vector.broadcast %187 : i32 to vector<16x1xi32>
        %189 = arith.cmpi slt, %149, %188 : vector<16x1xi32>
        %190 = arith.andi %185, %189 : vector<16x1xi1>
        %c4_i32_88 = arith.constant 4 : i32
        %191 = arith.subi %18, %c4_i32_88 : i32
        %192 = vector.broadcast %191 : i32 to vector<1x16xi32>
        %193 = arith.cmpi sge, %150, %192 : vector<1x16xi32>
        %c4_i32_89 = arith.constant 4 : i32
        %194 = arith.addi %18, %c4_i32_89 : i32
        %195 = vector.broadcast %194 : i32 to vector<1x16xi32>
        %196 = arith.cmpi slt, %150, %195 : vector<1x16xi32>
        %197 = arith.andi %193, %196 : vector<1x16xi1>
        %198 = arith.mulf %179, %179 : vector<16x1xf32>
        %cst_90 = arith.constant -0.055555556 : f32
        %199 = vector.broadcast %cst_90 : f32 to vector<16x1xf32>
        %200 = arith.mulf %198, %199 : vector<16x1xf32>
        %201 = math.exp %200 : vector<16x1xf32>
        %cst_91 = arith.constant 0.000000e+00 : f32
        %202 = vector.broadcast %cst_91 : f32 to vector<16x1xf32>
        %203 = arith.select %190, %201, %202 : vector<16x1xi1>, vector<16x1xf32>
        %204 = arith.mulf %182, %182 : vector<1x16xf32>
        %cst_92 = arith.constant -0.055555556 : f32
        %205 = vector.broadcast %cst_92 : f32 to vector<1x16xf32>
        %206 = arith.mulf %204, %205 : vector<1x16xf32>
        %207 = math.exp %206 : vector<1x16xf32>
        %cst_93 = arith.constant 0.000000e+00 : f32
        %208 = vector.broadcast %cst_93 : f32 to vector<1x16xf32>
        %209 = arith.select %197, %207, %208 : vector<1x16xi1>, vector<1x16xf32>
        %210 = vector.broadcast %203 : vector<16x1xf32> to vector<16x16xf32>
        %211 = vector.broadcast %209 : vector<1x16xf32> to vector<16x16xf32>
        %212 = arith.mulf %210, %211 : vector<16x16xf32>
        %c0_94 = arith.constant 0 : index
        %c0_95 = arith.constant 0 : index
        %213 = vector.load %arg7[%c0_94, %c0_95] : memref<16x16xf32, #tpu.memory_space<vmem>>, vector<16x16xf32>
        %214 = vector.broadcast %34 : i32 to vector<16x16xi32>
        %215 = arith.cmpi eq, %109, %214 : vector<16x16xi32>
        %cst_96 = arith.constant 0.000000e+00 : f32
        %216 = vector.broadcast %cst_96 : f32 to vector<16x16xf32>
        %217 = arith.select %215, %212, %216 : vector<16x16xi1>, vector<16x16xf32>
        %218 = arith.addf %213, %217 : vector<16x16xf32>
        %c0_97 = arith.constant 0 : index
        %c0_98 = arith.constant 0 : index
        %219 = vector.load %arg7[%c0_97, %c0_98] : memref<16x16xf32, #tpu.memory_space<vmem>>, vector<16x16xf32>
        tpu.vector_store %arg7[%c0_97, %c0_98], %218 {strides = array<i32>} : memref<16x16xf32, #tpu.memory_space<vmem>>, vector<16x16xf32>,
      } else {
      }
      %155 = arith.extui %60 : i1 to i32
      %c0_i32_71 = arith.constant 0 : i32
      %156 = arith.cmpi ne, %155, %c0_i32_71 : i32
      scf.if %156 {
        %177 = vector.broadcast %4 : i32 to vector<16x1xi32>
        %178 = arith.subi %149, %177 : vector<16x1xi32>
        %179 = arith.sitofp %178 : vector<16x1xi32> to vector<16x1xf32>
        %180 = vector.broadcast %20 : i32 to vector<1x16xi32>
        %181 = arith.subi %150, %180 : vector<1x16xi32>
        %182 = arith.sitofp %181 : vector<1x16xi32> to vector<1x16xf32>
        %c4_i32_85 = arith.constant 4 : i32
        %183 = arith.subi %4, %c4_i32_85 : i32
        %184 = vector.broadcast %183 : i32 to vector<16x1xi32>
        %185 = arith.cmpi sge, %149, %184 : vector<16x1xi32>
        %c1_i32_86 = arith.constant 1 : i32
        %186 = arith.addi %4, %c1_i32_86 : i32
        %c4_i32_87 = arith.constant 4 : i32
        %187 = arith.addi %186, %c4_i32_87 : i32
        %188 = vector.broadcast %187 : i32 to vector<16x1xi32>
        %189 = arith.cmpi slt, %149, %188 : vector<16x1xi32>
        %190 = arith.andi %185, %189 : vector<16x1xi1>
        %c4_i32_88 = arith.constant 4 : i32
        %191 = arith.subi %20, %c4_i32_88 : i32
        %192 = vector.broadcast %191 : i32 to vector<1x16xi32>
        %193 = arith.cmpi sge, %150, %192 : vector<1x16xi32>
        %c4_i32_89 = arith.constant 4 : i32
        %194 = arith.addi %20, %c4_i32_89 : i32
        %195 = vector.broadcast %194 : i32 to vector<1x16xi32>
        %196 = arith.cmpi slt, %150, %195 : vector<1x16xi32>
        %197 = arith.andi %193, %196 : vector<1x16xi1>
        %198 = arith.mulf %179, %179 : vector<16x1xf32>
        %cst_90 = arith.constant -0.055555556 : f32
        %199 = vector.broadcast %cst_90 : f32 to vector<16x1xf32>
        %200 = arith.mulf %198, %199 : vector<16x1xf32>
        %201 = math.exp %200 : vector<16x1xf32>
        %cst_91 = arith.constant 0.000000e+00 : f32
        %202 = vector.broadcast %cst_91 : f32 to vector<16x1xf32>
        %203 = arith.select %190, %201, %202 : vector<16x1xi1>, vector<16x1xf32>
        %204 = arith.mulf %182, %182 : vector<1x16xf32>
        %cst_92 = arith.constant -0.055555556 : f32
        %205 = vector.broadcast %cst_92 : f32 to vector<1x16xf32>
        %206 = arith.mulf %204, %205 : vector<1x16xf32>
        %207 = math.exp %206 : vector<1x16xf32>
        %cst_93 = arith.constant 0.000000e+00 : f32
        %208 = vector.broadcast %cst_93 : f32 to vector<1x16xf32>
        %209 = arith.select %197, %207, %208 : vector<1x16xi1>, vector<1x16xf32>
        %210 = vector.broadcast %203 : vector<16x1xf32> to vector<16x16xf32>
        %211 = vector.broadcast %209 : vector<1x16xf32> to vector<16x16xf32>
        %212 = arith.mulf %210, %211 : vector<16x16xf32>
        %c0_94 = arith.constant 0 : index
        %c0_95 = arith.constant 0 : index
        %213 = vector.load %arg7[%c0_94, %c0_95] : memref<16x16xf32, #tpu.memory_space<vmem>>, vector<16x16xf32>
        %214 = vector.broadcast %36 : i32 to vector<16x16xi32>
        %215 = arith.cmpi eq, %109, %214 : vector<16x16xi32>
        %cst_96 = arith.constant 0.000000e+00 : f32
        %216 = vector.broadcast %cst_96 : f32 to vector<16x16xf32>
        %217 = arith.select %215, %212, %216 : vector<16x16xi1>, vector<16x16xf32>
        %218 = arith.addf %213, %217 : vector<16x16xf32>
        %c0_97 = arith.constant 0 : index
        %c0_98 = arith.constant 0 : index
        %219 = vector.load %arg7[%c0_97, %c0_98] : memref<16x16xf32, #tpu.memory_space<vmem>>, vector<16x16xf32>
        tpu.vector_store %arg7[%c0_97, %c0_98], %218 {strides = array<i32>} : memref<16x16xf32, #tpu.memory_space<vmem>>, vector<16x16xf32>,
      } else {
      }
      %157 = arith.extui %66 : i1 to i32
      %c0_i32_72 = arith.constant 0 : i32
      %158 = arith.cmpi ne, %157, %c0_i32_72 : i32
      scf.if %158 {
        %177 = vector.broadcast %6 : i32 to vector<16x1xi32>
        %178 = arith.subi %149, %177 : vector<16x1xi32>
        %179 = arith.sitofp %178 : vector<16x1xi32> to vector<16x1xf32>
        %180 = vector.broadcast %22 : i32 to vector<1x16xi32>
        %181 = arith.subi %150, %180 : vector<1x16xi32>
        %182 = arith.sitofp %181 : vector<1x16xi32> to vector<1x16xf32>
        %c4_i32_85 = arith.constant 4 : i32
        %183 = arith.subi %6, %c4_i32_85 : i32
        %184 = vector.broadcast %183 : i32 to vector<16x1xi32>
        %185 = arith.cmpi sge, %149, %184 : vector<16x1xi32>
        %c1_i32_86 = arith.constant 1 : i32
        %186 = arith.addi %6, %c1_i32_86 : i32
        %c4_i32_87 = arith.constant 4 : i32
        %187 = arith.addi %186, %c4_i32_87 : i32
        %188 = vector.broadcast %187 : i32 to vector<16x1xi32>
        %189 = arith.cmpi slt, %149, %188 : vector<16x1xi32>
        %190 = arith.andi %185, %189 : vector<16x1xi1>
        %c4_i32_88 = arith.constant 4 : i32
        %191 = arith.subi %22, %c4_i32_88 : i32
        %192 = vector.broadcast %191 : i32 to vector<1x16xi32>
        %193 = arith.cmpi sge, %150, %192 : vector<1x16xi32>
        %c4_i32_89 = arith.constant 4 : i32
        %194 = arith.addi %22, %c4_i32_89 : i32
        %195 = vector.broadcast %194 : i32 to vector<1x16xi32>
        %196 = arith.cmpi slt, %150, %195 : vector<1x16xi32>
        %197 = arith.andi %193, %196 : vector<1x16xi1>
        %198 = arith.mulf %179, %179 : vector<16x1xf32>
        %cst_90 = arith.constant -0.055555556 : f32
        %199 = vector.broadcast %cst_90 : f32 to vector<16x1xf32>
        %200 = arith.mulf %198, %199 : vector<16x1xf32>
        %201 = math.exp %200 : vector<16x1xf32>
        %cst_91 = arith.constant 0.000000e+00 : f32
        %202 = vector.broadcast %cst_91 : f32 to vector<16x1xf32>
        %203 = arith.select %190, %201, %202 : vector<16x1xi1>, vector<16x1xf32>
        %204 = arith.mulf %182, %182 : vector<1x16xf32>
        %cst_92 = arith.constant -0.055555556 : f32
        %205 = vector.broadcast %cst_92 : f32 to vector<1x16xf32>
        %206 = arith.mulf %204, %205 : vector<1x16xf32>
        %207 = math.exp %206 : vector<1x16xf32>
        %cst_93 = arith.constant 0.000000e+00 : f32
        %208 = vector.broadcast %cst_93 : f32 to vector<1x16xf32>
        %209 = arith.select %197, %207, %208 : vector<1x16xi1>, vector<1x16xf32>
        %210 = vector.broadcast %203 : vector<16x1xf32> to vector<16x16xf32>
        %211 = vector.broadcast %209 : vector<1x16xf32> to vector<16x16xf32>
        %212 = arith.mulf %210, %211 : vector<16x16xf32>
        %c0_94 = arith.constant 0 : index
        %c0_95 = arith.constant 0 : index
        %213 = vector.load %arg7[%c0_94, %c0_95] : memref<16x16xf32, #tpu.memory_space<vmem>>, vector<16x16xf32>
        %214 = vector.broadcast %38 : i32 to vector<16x16xi32>
        %215 = arith.cmpi eq, %109, %214 : vector<16x16xi32>
        %cst_96 = arith.constant 0.000000e+00 : f32
        %216 = vector.broadcast %cst_96 : f32 to vector<16x16xf32>
        %217 = arith.select %215, %212, %216 : vector<16x16xi1>, vector<16x16xf32>
        %218 = arith.addf %213, %217 : vector<16x16xf32>
        %c0_97 = arith.constant 0 : index
        %c0_98 = arith.constant 0 : index
        %219 = vector.load %arg7[%c0_97, %c0_98] : memref<16x16xf32, #tpu.memory_space<vmem>>, vector<16x16xf32>
        tpu.vector_store %arg7[%c0_97, %c0_98], %218 {strides = array<i32>} : memref<16x16xf32, #tpu.memory_space<vmem>>, vector<16x16xf32>,
      } else {
      }
      %159 = arith.extui %72 : i1 to i32
      %c0_i32_73 = arith.constant 0 : i32
      %160 = arith.cmpi ne, %159, %c0_i32_73 : i32
      scf.if %160 {
        %177 = vector.broadcast %8 : i32 to vector<16x1xi32>
        %178 = arith.subi %149, %177 : vector<16x1xi32>
        %179 = arith.sitofp %178 : vector<16x1xi32> to vector<16x1xf32>
        %180 = vector.broadcast %24 : i32 to vector<1x16xi32>
        %181 = arith.subi %150, %180 : vector<1x16xi32>
        %182 = arith.sitofp %181 : vector<1x16xi32> to vector<1x16xf32>
        %c4_i32_85 = arith.constant 4 : i32
        %183 = arith.subi %8, %c4_i32_85 : i32
        %184 = vector.broadcast %183 : i32 to vector<16x1xi32>
        %185 = arith.cmpi sge, %149, %184 : vector<16x1xi32>
        %c1_i32_86 = arith.constant 1 : i32
        %186 = arith.addi %8, %c1_i32_86 : i32
        %c4_i32_87 = arith.constant 4 : i32
        %187 = arith.addi %186, %c4_i32_87 : i32
        %188 = vector.broadcast %187 : i32 to vector<16x1xi32>
        %189 = arith.cmpi slt, %149, %188 : vector<16x1xi32>
        %190 = arith.andi %185, %189 : vector<16x1xi1>
        %c4_i32_88 = arith.constant 4 : i32
        %191 = arith.subi %24, %c4_i32_88 : i32
        %192 = vector.broadcast %191 : i32 to vector<1x16xi32>
        %193 = arith.cmpi sge, %150, %192 : vector<1x16xi32>
        %c4_i32_89 = arith.constant 4 : i32
        %194 = arith.addi %24, %c4_i32_89 : i32
        %195 = vector.broadcast %194 : i32 to vector<1x16xi32>
        %196 = arith.cmpi slt, %150, %195 : vector<1x16xi32>
        %197 = arith.andi %193, %196 : vector<1x16xi1>
        %198 = arith.mulf %179, %179 : vector<16x1xf32>
        %cst_90 = arith.constant -0.055555556 : f32
        %199 = vector.broadcast %cst_90 : f32 to vector<16x1xf32>
        %200 = arith.mulf %198, %199 : vector<16x1xf32>
        %201 = math.exp %200 : vector<16x1xf32>
        %cst_91 = arith.constant 0.000000e+00 : f32
        %202 = vector.broadcast %cst_91 : f32 to vector<16x1xf32>
        %203 = arith.select %190, %201, %202 : vector<16x1xi1>, vector<16x1xf32>
        %204 = arith.mulf %182, %182 : vector<1x16xf32>
        %cst_92 = arith.constant -0.055555556 : f32
        %205 = vector.broadcast %cst_92 : f32 to vector<1x16xf32>
        %206 = arith.mulf %204, %205 : vector<1x16xf32>
        %207 = math.exp %206 : vector<1x16xf32>
        %cst_93 = arith.constant 0.000000e+00 : f32
        %208 = vector.broadcast %cst_93 : f32 to vector<1x16xf32>
        %209 = arith.select %197, %207, %208 : vector<1x16xi1>, vector<1x16xf32>
        %210 = vector.broadcast %203 : vector<16x1xf32> to vector<16x16xf32>
        %211 = vector.broadcast %209 : vector<1x16xf32> to vector<16x16xf32>
        %212 = arith.mulf %210, %211 : vector<16x16xf32>
        %c0_94 = arith.constant 0 : index
        %c0_95 = arith.constant 0 : index
        %213 = vector.load %arg7[%c0_94, %c0_95] : memref<16x16xf32, #tpu.memory_space<vmem>>, vector<16x16xf32>
        %214 = vector.broadcast %40 : i32 to vector<16x16xi32>
        %215 = arith.cmpi eq, %109, %214 : vector<16x16xi32>
        %cst_96 = arith.constant 0.000000e+00 : f32
        %216 = vector.broadcast %cst_96 : f32 to vector<16x16xf32>
        %217 = arith.select %215, %212, %216 : vector<16x16xi1>, vector<16x16xf32>
        %218 = arith.addf %213, %217 : vector<16x16xf32>
        %c0_97 = arith.constant 0 : index
        %c0_98 = arith.constant 0 : index
        %219 = vector.load %arg7[%c0_97, %c0_98] : memref<16x16xf32, #tpu.memory_space<vmem>>, vector<16x16xf32>
        tpu.vector_store %arg7[%c0_97, %c0_98], %218 {strides = array<i32>} : memref<16x16xf32, #tpu.memory_space<vmem>>, vector<16x16xf32>,
      } else {
      }
      %161 = arith.extui %78 : i1 to i32
      %c0_i32_74 = arith.constant 0 : i32
      %162 = arith.cmpi ne, %161, %c0_i32_74 : i32
      scf.if %162 {
        %177 = vector.broadcast %10 : i32 to vector<16x1xi32>
        %178 = arith.subi %149, %177 : vector<16x1xi32>
        %179 = arith.sitofp %178 : vector<16x1xi32> to vector<16x1xf32>
        %180 = vector.broadcast %26 : i32 to vector<1x16xi32>
        %181 = arith.subi %150, %180 : vector<1x16xi32>
        %182 = arith.sitofp %181 : vector<1x16xi32> to vector<1x16xf32>
        %c4_i32_85 = arith.constant 4 : i32
        %183 = arith.subi %10, %c4_i32_85 : i32
        %184 = vector.broadcast %183 : i32 to vector<16x1xi32>
        %185 = arith.cmpi sge, %149, %184 : vector<16x1xi32>
        %c1_i32_86 = arith.constant 1 : i32
        %186 = arith.addi %10, %c1_i32_86 : i32
        %c4_i32_87 = arith.constant 4 : i32
        %187 = arith.addi %186, %c4_i32_87 : i32
        %188 = vector.broadcast %187 : i32 to vector<16x1xi32>
        %189 = arith.cmpi slt, %149, %188 : vector<16x1xi32>
        %190 = arith.andi %185, %189 : vector<16x1xi1>
        %c4_i32_88 = arith.constant 4 : i32
        %191 = arith.subi %26, %c4_i32_88 : i32
        %192 = vector.broadcast %191 : i32 to vector<1x16xi32>
        %193 = arith.cmpi sge, %150, %192 : vector<1x16xi32>
        %c4_i32_89 = arith.constant 4 : i32
        %194 = arith.addi %26, %c4_i32_89 : i32
        %195 = vector.broadcast %194 : i32 to vector<1x16xi32>
        %196 = arith.cmpi slt, %150, %195 : vector<1x16xi32>
        %197 = arith.andi %193, %196 : vector<1x16xi1>
        %198 = arith.mulf %179, %179 : vector<16x1xf32>
        %cst_90 = arith.constant -0.055555556 : f32
        %199 = vector.broadcast %cst_90 : f32 to vector<16x1xf32>
        %200 = arith.mulf %198, %199 : vector<16x1xf32>
        %201 = math.exp %200 : vector<16x1xf32>
        %cst_91 = arith.constant 0.000000e+00 : f32
        %202 = vector.broadcast %cst_91 : f32 to vector<16x1xf32>
        %203 = arith.select %190, %201, %202 : vector<16x1xi1>, vector<16x1xf32>
        %204 = arith.mulf %182, %182 : vector<1x16xf32>
        %cst_92 = arith.constant -0.055555556 : f32
        %205 = vector.broadcast %cst_92 : f32 to vector<1x16xf32>
        %206 = arith.mulf %204, %205 : vector<1x16xf32>
        %207 = math.exp %206 : vector<1x16xf32>
        %cst_93 = arith.constant 0.000000e+00 : f32
        %208 = vector.broadcast %cst_93 : f32 to vector<1x16xf32>
        %209 = arith.select %197, %207, %208 : vector<1x16xi1>, vector<1x16xf32>
        %210 = vector.broadcast %203 : vector<16x1xf32> to vector<16x16xf32>
        %211 = vector.broadcast %209 : vector<1x16xf32> to vector<16x16xf32>
        %212 = arith.mulf %210, %211 : vector<16x16xf32>
        %c0_94 = arith.constant 0 : index
        %c0_95 = arith.constant 0 : index
        %213 = vector.load %arg7[%c0_94, %c0_95] : memref<16x16xf32, #tpu.memory_space<vmem>>, vector<16x16xf32>
        %214 = vector.broadcast %42 : i32 to vector<16x16xi32>
        %215 = arith.cmpi eq, %109, %214 : vector<16x16xi32>
        %cst_96 = arith.constant 0.000000e+00 : f32
        %216 = vector.broadcast %cst_96 : f32 to vector<16x16xf32>
        %217 = arith.select %215, %212, %216 : vector<16x16xi1>, vector<16x16xf32>
        %218 = arith.addf %213, %217 : vector<16x16xf32>
        %c0_97 = arith.constant 0 : index
        %c0_98 = arith.constant 0 : index
        %219 = vector.load %arg7[%c0_97, %c0_98] : memref<16x16xf32, #tpu.memory_space<vmem>>, vector<16x16xf32>
        tpu.vector_store %arg7[%c0_97, %c0_98], %218 {strides = array<i32>} : memref<16x16xf32, #tpu.memory_space<vmem>>, vector<16x16xf32>,
      } else {
      }
      %163 = arith.extui %84 : i1 to i32
      %c0_i32_75 = arith.constant 0 : i32
      %164 = arith.cmpi ne, %163, %c0_i32_75 : i32
      scf.if %164 {
        %177 = vector.broadcast %12 : i32 to vector<16x1xi32>
        %178 = arith.subi %149, %177 : vector<16x1xi32>
        %179 = arith.sitofp %178 : vector<16x1xi32> to vector<16x1xf32>
        %180 = vector.broadcast %28 : i32 to vector<1x16xi32>
        %181 = arith.subi %150, %180 : vector<1x16xi32>
        %182 = arith.sitofp %181 : vector<1x16xi32> to vector<1x16xf32>
        %c4_i32_85 = arith.constant 4 : i32
        %183 = arith.subi %12, %c4_i32_85 : i32
        %184 = vector.broadcast %183 : i32 to vector<16x1xi32>
        %185 = arith.cmpi sge, %149, %184 : vector<16x1xi32>
        %c1_i32_86 = arith.constant 1 : i32
        %186 = arith.addi %12, %c1_i32_86 : i32
        %c4_i32_87 = arith.constant 4 : i32
        %187 = arith.addi %186, %c4_i32_87 : i32
        %188 = vector.broadcast %187 : i32 to vector<16x1xi32>
        %189 = arith.cmpi slt, %149, %188 : vector<16x1xi32>
        %190 = arith.andi %185, %189 : vector<16x1xi1>
        %c4_i32_88 = arith.constant 4 : i32
        %191 = arith.subi %28, %c4_i32_88 : i32
        %192 = vector.broadcast %191 : i32 to vector<1x16xi32>
        %193 = arith.cmpi sge, %150, %192 : vector<1x16xi32>
        %c4_i32_89 = arith.constant 4 : i32
        %194 = arith.addi %28, %c4_i32_89 : i32
        %195 = vector.broadcast %194 : i32 to vector<1x16xi32>
        %196 = arith.cmpi slt, %150, %195 : vector<1x16xi32>
        %197 = arith.andi %193, %196 : vector<1x16xi1>
        %198 = arith.mulf %179, %179 : vector<16x1xf32>
        %cst_90 = arith.constant -0.055555556 : f32
        %199 = vector.broadcast %cst_90 : f32 to vector<16x1xf32>
        %200 = arith.mulf %198, %199 : vector<16x1xf32>
        %201 = math.exp %200 : vector<16x1xf32>
        %cst_91 = arith.constant 0.000000e+00 : f32
        %202 = vector.broadcast %cst_91 : f32 to vector<16x1xf32>
        %203 = arith.select %190, %201, %202 : vector<16x1xi1>, vector<16x1xf32>
        %204 = arith.mulf %182, %182 : vector<1x16xf32>
        %cst_92 = arith.constant -0.055555556 : f32
        %205 = vector.broadcast %cst_92 : f32 to vector<1x16xf32>
        %206 = arith.mulf %204, %205 : vector<1x16xf32>
        %207 = math.exp %206 : vector<1x16xf32>
        %cst_93 = arith.constant 0.000000e+00 : f32
        %208 = vector.broadcast %cst_93 : f32 to vector<1x16xf32>
        %209 = arith.select %197, %207, %208 : vector<1x16xi1>, vector<1x16xf32>
        %210 = vector.broadcast %203 : vector<16x1xf32> to vector<16x16xf32>
        %211 = vector.broadcast %209 : vector<1x16xf32> to vector<16x16xf32>
        %212 = arith.mulf %210, %211 : vector<16x16xf32>
        %c0_94 = arith.constant 0 : index
        %c0_95 = arith.constant 0 : index
        %213 = vector.load %arg7[%c0_94, %c0_95] : memref<16x16xf32, #tpu.memory_space<vmem>>, vector<16x16xf32>
        %214 = vector.broadcast %44 : i32 to vector<16x16xi32>
        %215 = arith.cmpi eq, %109, %214 : vector<16x16xi32>
        %cst_96 = arith.constant 0.000000e+00 : f32
        %216 = vector.broadcast %cst_96 : f32 to vector<16x16xf32>
        %217 = arith.select %215, %212, %216 : vector<16x16xi1>, vector<16x16xf32>
        %218 = arith.addf %213, %217 : vector<16x16xf32>
        %c0_97 = arith.constant 0 : index
        %c0_98 = arith.constant 0 : index
        %219 = vector.load %arg7[%c0_97, %c0_98] : memref<16x16xf32, #tpu.memory_space<vmem>>, vector<16x16xf32>
        tpu.vector_store %arg7[%c0_97, %c0_98], %218 {strides = array<i32>} : memref<16x16xf32, #tpu.memory_space<vmem>>, vector<16x16xf32>,
      } else {
      }
      %165 = arith.extui %90 : i1 to i32
      %c0_i32_76 = arith.constant 0 : i32
      %166 = arith.cmpi ne, %165, %c0_i32_76 : i32
      scf.if %166 {
        %177 = vector.broadcast %14 : i32 to vector<16x1xi32>
        %178 = arith.subi %149, %177 : vector<16x1xi32>
        %179 = arith.sitofp %178 : vector<16x1xi32> to vector<16x1xf32>
        %180 = vector.broadcast %30 : i32 to vector<1x16xi32>
        %181 = arith.subi %150, %180 : vector<1x16xi32>
        %182 = arith.sitofp %181 : vector<1x16xi32> to vector<1x16xf32>
        %c4_i32_85 = arith.constant 4 : i32
        %183 = arith.subi %14, %c4_i32_85 : i32
        %184 = vector.broadcast %183 : i32 to vector<16x1xi32>
        %185 = arith.cmpi sge, %149, %184 : vector<16x1xi32>
        %c1_i32_86 = arith.constant 1 : i32
        %186 = arith.addi %14, %c1_i32_86 : i32
        %c4_i32_87 = arith.constant 4 : i32
        %187 = arith.addi %186, %c4_i32_87 : i32
        %188 = vector.broadcast %187 : i32 to vector<16x1xi32>
        %189 = arith.cmpi slt, %149, %188 : vector<16x1xi32>
        %190 = arith.andi %185, %189 : vector<16x1xi1>
        %c4_i32_88 = arith.constant 4 : i32
        %191 = arith.subi %30, %c4_i32_88 : i32
        %192 = vector.broadcast %191 : i32 to vector<1x16xi32>
        %193 = arith.cmpi sge, %150, %192 : vector<1x16xi32>
        %c4_i32_89 = arith.constant 4 : i32
        %194 = arith.addi %30, %c4_i32_89 : i32
        %195 = vector.broadcast %194 : i32 to vector<1x16xi32>
        %196 = arith.cmpi slt, %150, %195 : vector<1x16xi32>
        %197 = arith.andi %193, %196 : vector<1x16xi1>
        %198 = arith.mulf %179, %179 : vector<16x1xf32>
        %cst_90 = arith.constant -0.055555556 : f32
        %199 = vector.broadcast %cst_90 : f32 to vector<16x1xf32>
        %200 = arith.mulf %198, %199 : vector<16x1xf32>
        %201 = math.exp %200 : vector<16x1xf32>
        %cst_91 = arith.constant 0.000000e+00 : f32
        %202 = vector.broadcast %cst_91 : f32 to vector<16x1xf32>
        %203 = arith.select %190, %201, %202 : vector<16x1xi1>, vector<16x1xf32>
        %204 = arith.mulf %182, %182 : vector<1x16xf32>
        %cst_92 = arith.constant -0.055555556 : f32
        %205 = vector.broadcast %cst_92 : f32 to vector<1x16xf32>
        %206 = arith.mulf %204, %205 : vector<1x16xf32>
        %207 = math.exp %206 : vector<1x16xf32>
        %cst_93 = arith.constant 0.000000e+00 : f32
        %208 = vector.broadcast %cst_93 : f32 to vector<1x16xf32>
        %209 = arith.select %197, %207, %208 : vector<1x16xi1>, vector<1x16xf32>
        %210 = vector.broadcast %203 : vector<16x1xf32> to vector<16x16xf32>
        %211 = vector.broadcast %209 : vector<1x16xf32> to vector<16x16xf32>
        %212 = arith.mulf %210, %211 : vector<16x16xf32>
        %c0_94 = arith.constant 0 : index
        %c0_95 = arith.constant 0 : index
        %213 = vector.load %arg7[%c0_94, %c0_95] : memref<16x16xf32, #tpu.memory_space<vmem>>, vector<16x16xf32>
        %214 = vector.broadcast %46 : i32 to vector<16x16xi32>
        %215 = arith.cmpi eq, %109, %214 : vector<16x16xi32>
        %cst_96 = arith.constant 0.000000e+00 : f32
        %216 = vector.broadcast %cst_96 : f32 to vector<16x16xf32>
        %217 = arith.select %215, %212, %216 : vector<16x16xi1>, vector<16x16xf32>
        %218 = arith.addf %213, %217 : vector<16x16xf32>
        %c0_97 = arith.constant 0 : index
        %c0_98 = arith.constant 0 : index
        %219 = vector.load %arg7[%c0_97, %c0_98] : memref<16x16xf32, #tpu.memory_space<vmem>>, vector<16x16xf32>
        tpu.vector_store %arg7[%c0_97, %c0_98], %218 {strides = array<i32>} : memref<16x16xf32, #tpu.memory_space<vmem>>, vector<16x16xf32>,
      } else {
      }
      %167 = arith.extui %96 : i1 to i32
      %c0_i32_77 = arith.constant 0 : i32
      %168 = arith.cmpi ne, %167, %c0_i32_77 : i32
      scf.if %168 {
        %177 = vector.broadcast %16 : i32 to vector<16x1xi32>
        %178 = arith.subi %149, %177 : vector<16x1xi32>
        %179 = arith.sitofp %178 : vector<16x1xi32> to vector<16x1xf32>
        %180 = vector.broadcast %32 : i32 to vector<1x16xi32>
        %181 = arith.subi %150, %180 : vector<1x16xi32>
        %182 = arith.sitofp %181 : vector<1x16xi32> to vector<1x16xf32>
        %c4_i32_85 = arith.constant 4 : i32
        %183 = arith.subi %16, %c4_i32_85 : i32
        %184 = vector.broadcast %183 : i32 to vector<16x1xi32>
        %185 = arith.cmpi sge, %149, %184 : vector<16x1xi32>
        %c1_i32_86 = arith.constant 1 : i32
        %186 = arith.addi %16, %c1_i32_86 : i32
        %c4_i32_87 = arith.constant 4 : i32
        %187 = arith.addi %186, %c4_i32_87 : i32
        %188 = vector.broadcast %187 : i32 to vector<16x1xi32>
        %189 = arith.cmpi slt, %149, %188 : vector<16x1xi32>
        %190 = arith.andi %185, %189 : vector<16x1xi1>
        %c4_i32_88 = arith.constant 4 : i32
        %191 = arith.subi %32, %c4_i32_88 : i32
        %192 = vector.broadcast %191 : i32 to vector<1x16xi32>
        %193 = arith.cmpi sge, %150, %192 : vector<1x16xi32>
        %c4_i32_89 = arith.constant 4 : i32
        %194 = arith.addi %32, %c4_i32_89 : i32
        %195 = vector.broadcast %194 : i32 to vector<1x16xi32>
        %196 = arith.cmpi slt, %150, %195 : vector<1x16xi32>
        %197 = arith.andi %193, %196 : vector<1x16xi1>
        %198 = arith.mulf %179, %179 : vector<16x1xf32>
        %cst_90 = arith.constant -0.055555556 : f32
        %199 = vector.broadcast %cst_90 : f32 to vector<16x1xf32>
        %200 = arith.mulf %198, %199 : vector<16x1xf32>
        %201 = math.exp %200 : vector<16x1xf32>
        %cst_91 = arith.constant 0.000000e+00 : f32
        %202 = vector.broadcast %cst_91 : f32 to vector<16x1xf32>
        %203 = arith.select %190, %201, %202 : vector<16x1xi1>, vector<16x1xf32>
        %204 = arith.mulf %182, %182 : vector<1x16xf32>
        %cst_92 = arith.constant -0.055555556 : f32
        %205 = vector.broadcast %cst_92 : f32 to vector<1x16xf32>
        %206 = arith.mulf %204, %205 : vector<1x16xf32>
        %207 = math.exp %206 : vector<1x16xf32>
        %cst_93 = arith.constant 0.000000e+00 : f32
        %208 = vector.broadcast %cst_93 : f32 to vector<1x16xf32>
        %209 = arith.select %197, %207, %208 : vector<1x16xi1>, vector<1x16xf32>
        %210 = vector.broadcast %203 : vector<16x1xf32> to vector<16x16xf32>
        %211 = vector.broadcast %209 : vector<1x16xf32> to vector<16x16xf32>
        %212 = arith.mulf %210, %211 : vector<16x16xf32>
        %c0_94 = arith.constant 0 : index
        %c0_95 = arith.constant 0 : index
        %213 = vector.load %arg7[%c0_94, %c0_95] : memref<16x16xf32, #tpu.memory_space<vmem>>, vector<16x16xf32>
        %214 = vector.broadcast %48 : i32 to vector<16x16xi32>
        %215 = arith.cmpi eq, %109, %214 : vector<16x16xi32>
        %cst_96 = arith.constant 0.000000e+00 : f32
        %216 = vector.broadcast %cst_96 : f32 to vector<16x16xf32>
        %217 = arith.select %215, %212, %216 : vector<16x16xi1>, vector<16x16xf32>
        %218 = arith.addf %213, %217 : vector<16x16xf32>
        %c0_97 = arith.constant 0 : index
        %c0_98 = arith.constant 0 : index
        %219 = vector.load %arg7[%c0_97, %c0_98] : memref<16x16xf32, #tpu.memory_space<vmem>>, vector<16x16xf32>
        tpu.vector_store %arg7[%c0_97, %c0_98], %218 {strides = array<i32>} : memref<16x16xf32, #tpu.memory_space<vmem>>, vector<16x16xf32>,
      } else {
      }
      %c0_78 = arith.constant 0 : index
      %c0_79 = arith.constant 0 : index
      %169 = vector.load %arg7[%c0_78, %c0_79] : memref<16x16xf32, #tpu.memory_space<vmem>>, vector<16x16xf32>
      %170 = arith.mulf %146, %169 : vector<16x16xf32>
      %171 = vector.shape_cast %170 : vector<16x16xf32> to vector<1x16x16xf32>
      %cst_80 = arith.constant dense<0.000000e+00> : vector<1xf32>
      %172 = vector.multi_reduction <add>, %171, %cst_80 [1, 2] : vector<1x16x16xf32> to vector<1xf32>
      %173 = vector.shape_cast %172 : vector<1xf32> to vector<1x1x1xf32>
      %174 = vector.extract %173[0, 0, 0] : f32 from vector<1x1x1xf32>
      %175 = vector.broadcast %174 : f32 to vector<1x1x1x1xf32>
      %c0_81 = arith.constant 0 : index
      %c0_82 = arith.constant 0 : index
      %c0_83 = arith.constant 0 : index
      %c0_84 = arith.constant 0 : index
      %176 = vector.load %arg6[%c0_81, %c0_82, %c0_83, %c0_84] : memref<1x1x1x1xf32, #tpu.memory_space<vmem>>, vector<1x1x1x1xf32>
      tpu.vector_store %arg6[%c0_81, %c0_82, %c0_83, %c0_84], %175 {strides = array<i32>} : memref<1x1x1x1xf32, #tpu.memory_space<vmem>>, vector<1x1x1x1xf32>,
    } else {
    }
    return
  }
  func.func @transform_0(%arg0: i32, %arg1: i32, %arg2: memref<2x16xi32, #tpu.memory_space<smem>>, %arg3: memref<2x8xi32, #tpu.memory_space<smem>>) -> (i32, i32, i32, i32) {
    %c0_i32 = arith.constant 0 : i32
    %c0_i32_0 = arith.constant 0 : i32
    %c0_i32_1 = arith.constant 0 : i32
    return %arg0, %c0_i32, %arg1, %c0_i32_0 : i32, i32, i32, i32
  }
  func.func @transform_1(%arg0: i32, %arg1: i32, %arg2: memref<2x16xi32, #tpu.memory_space<smem>>, %arg3: memref<2x8xi32, #tpu.memory_space<smem>>) -> (i32, i32, i32, i32) {
    %c0_i32 = arith.constant 0 : i32
    %c0_i32_0 = arith.constant 0 : i32
    %c0_i32_1 = arith.constant 0 : i32
    return %arg0, %c0_i32, %arg1, %c0_i32_0 : i32, i32, i32, i32
  }
  func.func @transform_2(%arg0: i32, %arg1: i32, %arg2: memref<2x16xi32, #tpu.memory_space<smem>>, %arg3: memref<2x8xi32, #tpu.memory_space<smem>>) -> (i32, i32, i32, i32) {
    %c0_i32 = arith.constant 0 : i32
    %c0_i32_0 = arith.constant 0 : i32
    %c0_i32_1 = arith.constant 0 : i32
    return %arg0, %arg1, %c0_i32, %c0_i32_0 : i32, i32, i32, i32
  }
}

</mosaic_0001>

<bundles_post_ra>
// kernel: tpu_custom_call.1
= control target key start
LH: loop header
LB: loop body
LE: loop exit
PB: predicated region body
PF: predicated region fallthrough
CT: control target
= control target key end

     0   :  { %s2025_s0 = inlined_call_operand.hbm [shape: s32[2,16], index: 0, kind: input, shape index: {}]   ;;  %s2026_s2 = inlined_call_operand.hbm [shape: f32[2,3,16,16], index: 2, kind: input, shape index: {}]   ;;  %s2027_s3 = inlined_call_operand.hbm [shape: s32[2,1,16,16], index: 3, kind: input, shape index: {}]   ;;  %s2028_s4 = inlined_call_operand.vmem [shape: f32[2,1,1,1], index: 4, kind: output, shape index: {}]   ;;  %s2029_s1 = inlined_call_operand.vmem [shape: s32[2,8], index: 1, kind: input, shape index: {}]  }
   0x1   :  { %2079 = sst [smem:[#allocation39_spill]] %s2026_s2  ;;  %s1134_s17 = scalar_lea.hbm %s2025_s0, 32 }
   0x2   :  { %2080 = sst [smem:[#allocation40_spill]] %s2027_s3  ;;  %p1135_p0 = scmp.ne.s32.totalorder %s2025_s0, %s1134_s17 }
   0x3   :  { %p1138_p1 = scmp.lt.u32.totalorder %s1134_s17, %s2025_s0 }
   0x5   :  { %p1140_p2 = pnand %p1138_p1, %p1135_p0 }
   0x7   :  { %1143 = shalt.err (!%p1140_p2)  }
   0x8   :  { %s1274_s22 = smov [#allocation4]   ;;  %s11_s27 = sshll.u32 %s2029_s1, 4  ;;  %s12_s27 = int_to_ptr.vmem [resolvable:$true] %s11_s27 }
   0x9   :  { %10 = dma.hbm_to_smem %s2025_s0, 32, %s1274_s22, [#allocation3] }
   0xa   :  { %s1144_s28 = scalar_lea.vmem %s12_s27, 32  ;;  %p1149_p4 = scmp.lt.s32.totalorder %s12_s27, %s12_s27 }
   0xb   :  { %p1145_p3 = scmp.ne.s32.totalorder %s12_s27, %s1144_s28  ;;  %p1150_p5 = scmp.lt.s32.totalorder %s1144_s28, %s1144_s28 }
   0xd   :  { %p1151_p6 = por %p1150_p5, %p1149_p4 }
   0xf   :  { %p1152_p7 = pnand %p1151_p6, %p1145_p3 }
  0x11   :  { %1155 = shalt.err (!%p1152_p7)  }
  0x12   :  { %s1275_s29 = smov [#allocation5]  }
  0x13   :  { %14 = dma.vmem_to_smem %s12_s27, 32, %s1275_s29, [#allocation3] }
  0x14   :  { %1240 = dma.done.wait [#allocation3], 64 }
  0x15   :  { %1241 = vsyncadd [#allocation3], 4294967232 }
  0x16   :  { %16 = sfence }
  0x17   :  { %17 = vsyncpa [#allocation7], 0 }
  0x18   :  { %19 = vsyncpa [#allocation7 + $0x1], 0 }
  0x19   :  { %20 = vsyncpa [#allocation9], 0 }
  0x1a   :  { %22 = vsyncpa [#allocation9 + $0x1], 0  ;;  %s1322_s0 = smov 0   ;;  %s1324_s1 = smov 0  }
  0x1b   :  { %s1326_s30 = smov 0   ;;  %s1328_s5 = smov 0  }
  0x1c   :  { %s1330_s6 = smov 0   ;;  %s1332_s7 = smov 0  }
  0x1d LB: > { %2081 = sst [smem:[#allocation13_spill]] %s1256_s1  ;;  %s965_s8 = sadd.s32 4294967295, %s1272_s7   ;;  %s1272_s7 = sphi %s1332_s7, %s28_s7   ;;  %s1268_s6 = sphi %s1330_s6, %s2204_s6   ;;  %s1264_s5 = sphi %s1328_s5, %s2203_s5   ;;  %s1260_s30 = sphi %s1326_s30, %s2202_s30   ;;  %s1256_s1 = sphi %s1324_s1, %s2201_s1   ;;  %s1252_s0 = sphi %s1322_s0, %s2200_s0  }
  0x1e   : > { %2082 = sst [smem:[#allocation14_spill]] %s1260_s30  ;;  %s40_s9 = sadd.s32 1, %s1268_s6 }
  0x1f   : > { %2083 = sst [smem:[#allocation15_spill]] %s1268_s6  ;;  %p42_p8 = scmp.ge.s32.totalorder %s40_s9, 2 }
  0x20   : > { %2084 = sst [smem:[#allocation16_spill]] %s1272_s7  ;;  %s49_s10 = sadd.s32 1, %s1260_s30 }
  0x21   : > { %p56_p9 = scmp.ne.s32.totalorder %s1260_s30, %s1256_s1  ;;  %p57_p10 = scmp.eq.s32.totalorder %s1272_s7, 0 }
  0x22   : > { %s2206_s9 = smov (%p42_p8, %s40_s9), 0  ;;  %p62_p12 = scmp.ne.s32.totalorder %s1256_s1, %s1252_s0 }
  0x23   : > { %2085 = sst [smem:[#allocation17_spill]] %s2206_s9  ;;  %p58_p11 = por %p57_p10, %p56_p9 }
  0x24   : > { %s44_s11 = ssub.s32 %s1268_s6, %s2206_s9  ;;  %p63_p13 = scmp.eq.s32.totalorder %s965_s8, 0 }
  0x25   : > { %p47_p0 = scmp.eq.s32.totalorder %s44_s11, 0  ;;  %p1015_p2 = scmp.lt.s32.totalorder %s1272_s7, 2 }
  0x26   : > { %p1361_p1 = por %p63_p13, %p62_p12  ;;  %s1370_s14 = sand.u32 1, %s1260_s30  }
  0x27   : > { %s1367_s13 = scalar_select %p47_p0, %s1260_s30, %s49_s10  }
  0x28   : > { %s2086_s12 = scalar_select %p1361_p1, 1, 0 }
  0x29   : > { %2087 = sst [smem:[#allocation18_spill]] %s1367_s13  ;;  %s1000_s15 = smul.u32 768, %s1268_s6 }
  0x2a   : > { %s999_s16 = smul.u32 48, %s1370_s14  ;;  %s2088_s2 = sld [smem:[#allocation39_spill]] }
  0x2b   : > { %p1379_p3 = pnand %p1015_p2, %p58_p11  ;;  %s143_s23 = scalar_lea.sflag [#allocation7], %s1370_s14 }
  0x2c   : > { %s146_s21 = scalar_lea.vmem [#allocation6], %s999_s16 }
  0x2d   : > { %s155_s22 = sshll.u32 %s146_s21, 4  ;;  %p1158_p5 = pneg %p1379_p3  ;;  %s1383_s22 = int_to_ptr.vmem [resolvable:$true] %s155_s22 }
  0x30   : > { %s1377_s19 = scalar_lea.hbm %s2088_s2, %s1000_s15  ;;  %s1161_s27 = scalar_lea.hbm %s2088_s2, 1536 }
  0x31   : > { %s1156_s24 = scalar_lea.hbm %s1377_s19, 768  ;;  %p1162_p8 = scmp.lt.u32.totalorder %s1377_s19, %s2088_s2 }
  0x32   : > { %p1157_p4 = scmp.ne.s32.totalorder %s1377_s19, %s1156_s24  ;;  %p1163_p9 = scmp.lt.u32.totalorder %s1161_s27, %s1156_s24 }
  0x33   : > { %p1165_p11 = scmp.lt.u32.totalorder %s1156_s24, %s1377_s19 }
  0x34   : > { %p1159_p6 = pnand %p1158_p5, %p1157_p4  ;;  %p1164_p10 = por %p1163_p9, %p1162_p8 }
  0x36   : > { %p1160_p7 = pneg %p1159_p6  ;;  %p1166_p12 = por %p1165_p11, %p1164_p10 }
  0x38   : > { %p1167_p13 = pnand %p1166_p12, %p1160_p7 }
  0x3a   : > { %1170 = shalt.err (!%p1167_p13)
}
  0x3b   : > { %s1171_s0 = scalar_lea.vmem %s1383_s22, 768  ;;  %s1276_s8 = smov [#allocation6]  }
  0x3c   : > { %p1172_p0 = scmp.ne.s32.totalorder %s1383_s22, %s1171_s0  ;;  %s1176_s10 = sshll.u32 %s1276_s8, 4  ;;  %s1177_s10 = int_to_ptr.vmem [resolvable:$false] %s1176_s10 }
  0x3d   : > { %s1178_s11 = scalar_lea.vmem %s1177_s10, 1536  ;;  %p1179_p6 = scmp.lt.s32.totalorder %s1383_s22, %s1177_s10 }
  0x3e   : > { %p1174_p2 = pnand %p1172_p0, %p1158_p5  ;;  %p1180_p8 = scmp.lt.s32.totalorder %s1178_s11, %s1171_s0 }
  0x40   : > { %p1175_p4 = pneg %p1174_p2  ;;  %p1181_p9 = por %p1180_p8, %p1179_p6 }
  0x42   : > { %p1182_p10 = pnand %p1181_p9, %p1175_p4 }
  0x44   : > { %1185 = shalt.err (!%p1182_p10)
}
  0x45   : > { %s1277_s15 = smov 128   ;;  %s1278_s16 = smov 8  }
  0x46   : > { %1011 = dma.hbm_to_vmem [thread:$0]  (!%p1379_p3), %s1377_s19, 768, %s1383_s22, %s143_s23, %s1277_s15, %s1277_s15, %s1278_s16  }
  0x47   : > { %p973_p7 = scmp.ge.s32.totalorder %s1272_s7, 1  ;;  %p186_p11 = scmp.lt.s32.totalorder %s1272_s7, 3 }
  0x48   : > { %s970_s17 = sshll.u32 %s1370_s14, 4  ;;  %s998_s21 = sshll.u32 %s1268_s6, 8 }
  0x49   : > { %p1419_p12 = pnand %p973_p7, %p186_p11  ;;  %s169_s24 = scalar_lea.vmem [#allocation8], %s970_s17 }
  0x4a   : > { %s178_s25 = sshll.u32 %s169_s24, 4  ;;  %s2091_s3 = sld [smem:[#allocation40_spill]]  ;;  %s1429_s25 = int_to_ptr.vmem [resolvable:$true] %s178_s25 }
  0x4b   : > { %s166_s19 = scalar_lea.sflag [#allocation9], %s1370_s14 }
  0x50   : > { %s1427_s28 = scalar_lea.hbm %s2091_s3, %s998_s21  ;;  %s1191_s0 = scalar_lea.hbm %s2091_s3, 512 }
  0x51   : > { %s1186_s22 = scalar_lea.hbm %s1427_s28, 256  ;;  %p1192_p4 = scmp.lt.u32.totalorder %s1427_s28, %s2091_s3 }
  0x52   : > { %p1187_p13 = scmp.ne.s32.totalorder %s1427_s28, %s1186_s22  ;;  %p1193_p6 = scmp.lt.u32.totalorder %s1191_s0, %s1186_s22 }
  0x53   : > { %p1195_p9 = scmp.lt.u32.totalorder %s1186_s22, %s1427_s28 }
  0x54   : > { %p1189_p0 = pnand %p1187_p13, %p1158_p5  ;;  %p1194_p8 = por %p1193_p6, %p1192_p4 }
  0x56   : > { %p1190_p2 = pneg %p1189_p0  ;;  %p1196_p10 = por %p1195_p9, %p1194_p8 }
  0x58   : > { %p1197_p7 = pnand %p1196_p10, %p1190_p2 }
  0x5a   : > { %1200 = shalt.err (!%p1197_p7)
}
  0x5b   : > { %s1201_s11 = scalar_lea.vmem %s1429_s25, 256  ;;  %s1279_s17 = smov [#allocation8]  }
  0x5c   : > { %p1202_p11 = scmp.ne.s32.totalorder %s1429_s25, %s1201_s11  ;;  %s1206_s21 = sshll.u32 %s1279_s17, 4  ;;  %s1207_s21 = int_to_ptr.vmem [resolvable:$false] %s1206_s21 }
  0x5d   : > { %s1208_s24 = scalar_lea.vmem %s1207_s21, 512  ;;  %p1209_p1 = scmp.lt.s32.totalorder %s1429_s25, %s1207_s21 }
  0x5e   : > { %p1204_p13 = pnand %p1202_p11, %p1158_p5  ;;  %p1210_p4 = scmp.lt.s32.totalorder %s1208_s24, %s1201_s11 }
  0x60   : > { %p1205_p0 = pneg %p1204_p13  ;;  %p1211_p6 = por %p1210_p4, %p1209_p1 }
  0x62   : > { %p1212_p8 = pnand %p1211_p6, %p1205_p0 }
  0x64   : > { %1215 = shalt.err (!%p1212_p8)
}
  0x65   : > { %1014 = dma.hbm_to_vmem [thread:$0]  (!%p1379_p3), %s1427_s28, 256, %s1429_s25, %s166_s19, %s1277_s15, %s1277_s15, %s1278_s16  }
  0x66   : > { %190 = sbr.rel (%p1419_p12) target bundleno = 756 (0x2f4), region = 28 }
  0x6d   : > { %s192_s26 = sand.u32 1, %s1256_s1   ;;  %p2092_p1 = scmp.ne.s32.totalorder %s2086_s12, 0 }
  0x6e   : > { %s1001_s27 = smul.u32 48, %s192_s26  ;;  %s193_s22 = scalar_lea.sflag [#allocation7], %s192_s26 }
  0x70   : > { %s1463_s23 = scalar_lea.vmem [#allocation6], %s1001_s27 }
  0x71   : > { %1243 = dma.done.wait (%p2092_p1), %s193_s22, 768  }
  0x72   : > { %1245 = vsyncadd (%p2092_p1), %s193_s22, 4294966528  ;;  %s974_s14 = sshll.u32 %s192_s26, 4  ;;  %s202_s20 = scalar_lea.sflag [#allocation9], %s192_s26 }
  0x73   : > { %s1469_s29 = scalar_lea.vmem [#allocation8], %s974_s14 }
  0x74   : > { %1247 = dma.done.wait (%p2092_p1), %s202_s20, 256  }
  0x75   : > { %1249 = vsyncadd (%p2092_p1), %s202_s20, 4294967040  ;;  %s1476_s15 = sshll.u32 %s1264_s5, 7  ;;  %vm337_vm0 = vcmask 0   ;;  %v1280_v0 = vmov 0.0  }
  0x76   : > { %s243_s16 = sadd.s32 2, %s1476_s15  ;;  %s2032_s18 = sadd.s32 4, %s1476_s15 }
  0x77   : > { %s2031_s25 = sadd.s32 6, %s1476_s15  ;;  %s249_s12 = sadd.s32 8, %s1476_s15 }
  0x78   : > { %s1483_s28 = sld [smem:[#allocation4 + %s1476_s15]]  ;;  %s251_s19 = sadd.s32 10, %s1476_s15 }
  0x79   : > { %s1486_s0 = sld [smem:[#allocation4 + %s243_s16]]  ;;  %s257_s21 = sadd.s32 1, %s1476_s15 }
  0x7a   : > { %s1490_s8 = sld [smem:[#allocation4 + %s2032_s18]]  ;;  %s259_s26 = sadd.s32 3, %s1476_s15 }
  0x7b   : > { %s1494_s10 = sld [smem:[#allocation4 + %s2031_s25]]  ;;  %s261_s22 = sadd.s32 5, %s1476_s15 }
  0x7c   : > { %s1496_s11 = sld [smem:[#allocation4 + %s249_s12]]  ;;  %s263_s20 = sadd.s32 7, %s1476_s15 }
  0x7d   : > { %s1498_s17 = sld [smem:[#allocation4 + %s251_s19]]  ;;  %s265_s12 = sadd.s32 9, %s1476_s15 }
  0x7e   : > { %s1501_s24 = sld [smem:[#allocation4 + %s257_s21]]  ;;  %s267_s19 = sadd.s32 11, %s1476_s15 }
  0x7f   : > { %s1504_s27 = sld [smem:[#allocation4 + %s259_s26]]  ;;  %s269_s3 = sadd.s32 13, %s1476_s15 }
  0x80   : > { %2093 = sst [smem:[#allocation19_spill]] %s1490_s8  ;;  %s271_s6 = sadd.s32 15, %s1476_s15 }
  0x81   : > { %2094 = sst [smem:[#allocation20_spill]] %s1494_s10  ;;  %s2105_s7 = sadd.s32 4, %s1476_s15 }
  0x82   : > { %2095 = sst [smem:[#allocation21_spill]] %s1496_s11 }
  0x83   : > { %2096 = sst [smem:[#allocation22_spill]] %s1498_s17 }
  0x84   : > { %s1507_s14 = sld [smem:[#allocation4 + %s261_s22]] }
  0x85   : > { %s1510_s25 = sld [smem:[#allocation4 + %s263_s20]] }
  0x86   : > { %s1513_s18 = sld [smem:[#allocation4 + %s265_s12]] }
  0x87   : > { %s1516_s2 = sld [smem:[#allocation4 + %s267_s19]] }
  0x88   : > { %s1519_s9 = sld [smem:[#allocation4 + %s269_s3]] }
  0x89   : > { %s1522_s13 = sld [smem:[#allocation4 + %s271_s6]] }
  0x8a   : > { %2097 = sst [smem:[#allocation23_spill]] %s1507_s14  ;;  %s2127_s14 = sadd.s32 4294967292, %s1496_s11 }
  0x8b   : > { %2098 = sst [smem:[#allocation24_spill]] %s1510_s25 }
  0x8c   : > { %2099 = sst [smem:[#allocation25_spill]] %s1513_s18  ;;  %s253_s18 = sadd.s32 12, %s1476_s15 }
  0x8d   : > { %2100 = sst [smem:[#allocation26_spill]] %s1516_s2 }
  0x8e   : > { %2101 = sst [smem:[#allocation27_spill]] %s1519_s9  ;;  %s2108_s9 = sadd.s32 6, %s1476_s15 }
  0x8f   : > { %2102 = sst [smem:[#allocation28_spill]] %s1522_s13 }
  0x90   : > { %s1525_s30 = sld [smem:[#allocation5 + %s1476_s15]] }
  0x91   : > { %s1527_s1 = sld [smem:[#allocation5 + %s257_s21]]  ;;  %s281_s21 = sadd.s32 4, %s1483_s28 }
  0x92   : > { %s1529_s12 = sld [smem:[#allocation5 + %s243_s16]]  ;;  %s2043_s16 = sadd.s32 4294967292, %s1483_s28 }
  0x93   : > { %s1531_s19 = sld [smem:[#allocation5 + %s259_s26]]  ;;  %p1548_p3 = scmp.ge.s32.totalorder %s281_s21, 0 }
  0x94   : > { %s1535_s2 = sld [smem:[#allocation5 + %s2105_s7]]  ;;  %s288_s7 = sadd.s32 4, %s1486_s0 }
  0x95   : > { %s1537_s3 = sld [smem:[#allocation5 + %s261_s22]]  ;;  %p1555_p5 = scmp.lt.s32.totalorder %s2043_s16, 16 }
  0x96   : > { %s1541_s6 = sld [smem:[#allocation5 + %s2108_s9]]  ;;  %s2044_s9 = sadd.s32 4294967292, %s1486_s0 }
  0x97   : > { %s1543_s13 = sld [smem:[#allocation5 + %s263_s20]]  ;;  %p1560_p12 = scmp.ge.s32.totalorder %s288_s7, 0 }
  0x98   : > { %2103 = sst [smem:[#allocation29_spill]] %s1529_s12  ;;  %p1566_p2 = scmp.lt.s32.totalorder %s2044_s9, 16 }
  0x99   : > { %2104 = sst [smem:[#allocation30_spill]] %s1531_s19  ;;  %s294_s21 = sadd.s32 4, %s1490_s8 }
  0x9a   : > { %2106 = sst [smem:[#allocation31_spill]] %s1535_s2  ;;  %s2045_s16 = sadd.s32 4294967292, %s1490_s8 }
  0x9b   : > { %2107 = sst [smem:[#allocation32_spill]] %s1537_s3  ;;  %s255_s7 = sadd.s32 14, %s1476_s15 }
  0x9c   : > { %2109 = sst [smem:[#allocation33_spill]] %s1541_s6  ;;  %p1575_p9 = scmp.ge.s32.totalorder %s294_s21, 0 }
  0x9d   : > { %2110 = sst [smem:[#allocation34_spill]] %s1543_s13  ;;  %p1581_p10 = scmp.lt.s32.totalorder %s2045_s16, 16 }
  0x9e   : > { %s2111_s25 = scalar_select %p1548_p3, 1, 0 }
  0x9f   : > { %s2112_s26 = scalar_select %p1555_p5, 1, 0 }
  0xa0   : > { %s2113_s22 = scalar_select %p1560_p12, 1, 0 }
  0xa1   : > { %s2114_s20 = scalar_select %p1566_p2, 1, 0 }
  0xa2   : > { %s1572_s13 = sld [smem:[#allocation4 + %s253_s18]]  ;;  %p2047_p7 = pnand %p1555_p5, %p1548_p3 }
  0xa3   : > { %s2115_s6 = scalar_select %p1575_p9, 1, 0 }
  0xa4   : > { %s2117_s9 = scalar_select %p1581_p10, 1, 0 }
  0xa5   : > { %2116 = sst [smem:[#allocation35_spill]] %s2115_s6  ;;  %s300_s18 = sadd.s32 4, %s1494_s10 }
  0xa6   : > { %2118 = sst [smem:[#allocation36_spill]] %s2117_s9  ;;  %p2051_p11 = pnand %p1566_p2, %p1560_p12 }
  0xa7   : > { %p1594_p13 = scmp.ge.s32.totalorder %s300_s18, 0  ;;  %p2054_p0 = pnand %p1581_p10, %p1575_p9 }
  0xa8   : > { %s2046_s21 = sadd.s32 4294967292, %s1494_s10  ;;  %s1603_s16 = sld [smem:[#allocation4 + %s255_s7]] }
  0xa9   : > { %s2119_s15 = scalar_select %p1594_p13, 1, 0 }
  0xaa   : > { %p1607_p4 = scmp.lt.s32.totalorder %s2046_s21, 16  ;;  %p1616_p6 = pneg %p2047_p7 }
  0xab   : > { %2120 = sst [smem:[#allocation37_spill]] %s2119_s15  ;;  %s306_s2 = sadd.s32 4, %s1496_s11 }
  0xac   : > { %s2121_s3 = scalar_select %p1607_p4, 1, 0 }
  0xad   : > { %p1631_p1 = pneg %p2051_p11  ;;  %p1640_p7 = pneg %p2054_p0 }
  0xae   : > { %2122 = sst [smem:[#allocation38_spill]] %s2121_s3  ;;  %s312_s10 = sadd.s32 4, %s1498_s17 }
  0xaf   : > { %p1646_p8 = scmp.ge.s32.totalorder %s306_s2, 0  ;;  %p1652_p11 = scmp.lt.s32.totalorder %s2127_s14, 16 }
  0xb0   : > { %p2129_p0 = pnand %p1607_p4, %p1594_p13  ;;  %s318_s2 = sadd.s32 4, %s1572_s13 }
  0xb1   : > { %s2126_s7 = scalar_select %p1646_p8, 1, 0 }
  0xb2   : > { %s2128_s8 = scalar_select %p1652_p11, 1, 0 }
  0xb3   : > { %p1661_p9 = pneg %p2129_p0  ;;  %p1666_p10 = scmp.ge.s32.totalorder %s312_s10, 0 }
  0xb4   : > { %s2132_s14 = sadd.s32 4294967292, %s1498_s17  ;;  %s982_s15 = sadd.s32 4294967292, %s1572_s13 }
  0xb5   : > { %s2130_s12 = scalar_select %p1661_p9, 1, 0 }
  0xb6   : > { %s2131_s11 = scalar_select %p1666_p10, 1, 0 }
  0xb7   : > { %p1672_p12 = scmp.lt.s32.totalorder %s2132_s14, 16  ;;  %s324_s6 = sadd.s32 4, %s1603_s16 }
  0xb8   : > { %p1682_p13 = scmp.ge.s32.totalorder %s318_s2, 0  ;;  %p1688_p4 = scmp.lt.s32.totalorder %s982_s15, 16 }
  0xb9   : > { %s2133_s3 = scalar_select %p1672_p12, 1, 0 }
  0xba   : > { %s2134_s10 = scalar_select %p1682_p13, 1, 0 }
  0xbb   : > { %s2135_s14 = scalar_select %p1688_p4, 1, 0 }
  0xbc   : > { %s983_s17 = sadd.s32 4294967292, %s1603_s16  ;;  %p1697_p3 = scmp.ge.s32.totalorder %s324_s6, 0 }
  0xbd   : > { %p1703_p0 = scmp.lt.s32.totalorder %s983_s17, 16  ;;  %p330_p5 = por %p1631_p1, %p1616_p6 }
  0xbe   : > { %p2138_p9 = pnand %p1652_p11, %p1646_p8  ;;  %p234_p10 = scmp.lt.s32.totalorder %s1264_s5, 1 }
  0xbf   : > { %s2137_s2 = scalar_select %p1703_p0, 1, 0 }
  0xc0   : > { %p311_p2 = pneg %p2138_p9  ;;  %p331_p12 = por %p330_p5, %p1640_p7 }
  0xc1   : > { %p2139_p0 = scmp.ne.s32.totalorder %s2133_s3, 0  ;;  %p2140_p1 = scmp.ne.s32.totalorder %s2131_s11, 0 }
  0xc2   : > { %p2143_p11 = pmov %p1697_p3  ;;  %p2144_p9 = scmp.ne.s32.totalorder %s2137_s2, 0 }
  0xc3   : > { %p2141_p6 = pnand %p2139_p0, %p2140_p1  ;;  %p2145_p4 = scmp.ne.s32.totalorder %s2130_s12, 0 }
  0xc4   : > { %p328_p3 = pnand %p2144_p9, %p2143_p11  ;;  %s2208_s5 = smov (!%p234_p10, %s1264_s5), 1 }
  0xc5   : > { %p1728_p8 = pneg %p2141_p6  ;;  %p332_p13 = por %p331_p12, %p2145_p4 }
  0xc6   : > { %p2146_p5 = scmp.ne.s32.totalorder %s2135_s14, 0  ;;  %p2147_p7 = scmp.ne.s32.totalorder %s2134_s10, 0 }
  0xc7   : > { %s2142_s6 = scalar_select %p1728_p8, 1, 0 }
  0xc8   : > { %p2148_p0 = pnand %p2146_p5, %p2147_p7  ;;  %p333_p6 = por %p332_p13, %p311_p2 }
  0xc9   : > { %s1747_s18 = scalar_lea.vmem %s2028_s4, %s2208_s5  ;;  %p329_p8 = pneg %p328_p3 }
  0xca   : > { %p323_p1 = pneg %p2148_p0  ;;  %p2149_p4 = scmp.ne.s32.totalorder %s2142_s6, 0  ;;  %338 = vst.msk [vmem:[%s1747_s18] sm:$0x1] %vm337_vm0, %v1280_v0 }
  0xcc   : > { %p334_p12 = por %p333_p6, %p2149_p4 }
  0xce   : > { %p335_p10 = por %p334_p12, %p323_p1 }
  0xd0   : > { %p336_p5 = por %p335_p10, %p329_p8 }
  0xd1   : > { %v344_v1 = vld [vmem:[%s1463_s23] sm:$0xff] (%p336_p5)  ;;  %v398_v2 = vlaneseq (%p336_p5)  ;;  %vm406_vm1 = vcmask (%p336_p5), 130048   ;;  %v345_v3 = vld [vmem:[%s1463_s23 + $0x8] sm:$0xff] (%p336_p5)  ;;  %v984_v4 = vld [vmem:[%s1463_s23 + $0x10] sm:$0xff] (%p336_p5)  ;;  %v1281_v6 = vmov (%p336_p5), 0.0   ;;  %p2150_p2 = scmp.ne.s32.totalorder (%p336_p5), %s2112_s26, 0 }
  0xd2   : > { %341 = sbr.rel (!%p336_p5) target bundleno = 756 (0x2f4), region = 40  ;;  %v985_v5 = vld [vmem:[%s1463_s23 + $0x18] sm:$0xff] (%p336_p5)  ;;  %407 = vst.msk [vmem:[#allocation2] sm:$0xff] (%p336_p5), %vm406_vm1, %v1281_v6  ;;  %408 = vst.msk [vmem:[#allocation2 + $0x8] sm:$0xff] (%p336_p5), %vm406_vm1, %v1281_v6  ;;  %v349_v7 = vmax.f32 (%p336_p5), %v344_v1, %v984_v4  ;;  %v986_v9 = vld [vmem:[%s1463_s23 + $0x20] sm:$0xff] (%p336_p5)  ;;  %p2151_p11 = scmp.ne.s32.totalorder (%p336_p5), %s2111_s25, 0 }
  0xd3   : > { %v350_v8 = vmax.f32 (%p336_p5), %v345_v3, %v985_v5  ;;  %v987_v10 = vld [vmem:[%s1463_s23 + $0x28] sm:$0xff] (%p336_p5)  ;;  %v1766_v11 = vshrl.u32 (%p336_p5), %v398_v2, 7  ;;  %v1768_v12 = vand.u32 (%p336_p5), 127, %v398_v2  ;;  %v1774_v32 = vld [vmem:[%s1469_s29] sm:$0xff] (%p336_p5) }
  0xd4   : > { %v354_v13 = vmax.f32 (%p336_p5), %v349_v7, %v986_v9  ;;  %v1777_v35 = vld [vmem:[%s1469_s29 + $0x8] sm:$0xff] (%p336_p5)  ;;  %vm364_vm2 = vcmp.eq.s32.totalorder (%p336_p5), %v1774_v32, 0  ;;  %vm376_vm4 = vcmp.eq.s32.totalorder (%p336_p5), %v1774_v32, 1  ;;  %vm388_vm6 = vcmp.eq.s32.totalorder (%p336_p5), %v1774_v32, 2  ;;  %p2152_p13 = pnand (%p336_p5), %p2150_p2, %p2151_p11 }
  0xd5   : > { %v355_v14 = vmax.f32 (%p336_p5), %v350_v8, %v987_v10  ;;  %v1771_v15 = vadd.s32 (%p336_p5), 8, %v1766_v11  ;;  %vm365_vm3 = vcmp.eq.s32.totalorder (%p336_p5), %v1777_v35, 0  ;;  %vm377_vm5 = vcmp.eq.s32.totalorder (%p336_p5), %v1777_v35, 1 }
  0xd6   : > { %v356_v16 = vsub.f32 (%p336_p5), %v344_v1, %v354_v13  ;;  %v368_v18 = vsub.f32 (%p336_p5), %v984_v4, %v354_v13  ;;  %v380_v20 = vsub.f32 (%p336_p5), %v986_v9, %v354_v13  ;;  %vm389_vm7 = vcmp.eq.s32.totalorder (%p336_p5), %v1777_v35, 2 }
  0xd7   : > { %v357_v17 = vsub.f32 (%p336_p5), %v345_v3, %v355_v14  ;;  %v369_v19 = vsub.f32 (%p336_p5), %v985_v5, %v355_v14  ;;  %v381_v21 = vsub.f32 (%p336_p5), %v987_v10, %v355_v14 }
  0xd8   : > { %v358_v22 = vmul.f32 (%p336_p5), 1.442695, %v356_v16  ;;  %v370_v24 = vmul.f32 (%p336_p5), 1.442695, %v368_v18  ;;  %v382_v26 = vmul.f32 (%p336_p5), 1.442695, %v380_v20 }
  0xd9   : > { %v360_v23 = vmul.f32 1.442695, %v357_v17  ;;  %v372_v25 = vmul.f32 1.442695, %v369_v19  ;;  %v384_v27 = vmul.f32 1.442695, %v381_v21  ;;  %v411_v52 = vstv (!%p2152_p13), %s1483_s28 }
  0xda   : > { %1070 = vpow2.f32 %v358_v22  ;;  %v416_v53 = vstv (!%p2152_p13), %s1501_s24  ;;  %v412_v54 = vsub.s32 (!%p2152_p13), %v1766_v11, %v411_v52  ;;  %v413_v58 = vsub.s32 (!%p2152_p13), %v1771_v15, %v411_v52  ;;  %s422_s5 = sadd.s32 (!%p2152_p13), 5, %s1483_s28  ;;  %s988_s23 = sadd.s32 (!%p2152_p13), 4294967292, %s1501_s24  ;;  %v452_v19 = vld [vmem:[#allocation2] sm:$0xff] (!%p2152_p13) }
  0xdb   : > { %1072 = vpow2.f32 %v360_v23  ;;  %v417_v55 = vsub.s32 (!%p2152_p13), %v1768_v12, %v416_v53  ;;  %s431_s29 = sadd.s32 (!%p2152_p13), 4, %s1501_s24  ;;  %s2153_s25 = sadd.s32 (!%p2152_p13), 4294967292, %s1483_s28  ;;  %v423_v6 = vstv (!%p2152_p13), %s422_s5  ;;  %v429_v7 = vstv (!%p2152_p13), %s988_s23  ;;  %v453_v23 = vld [vmem:[#allocation2 + $0x8] sm:$0xff] (!%p2152_p13) }
  0xdc   : > { %1074 = vpow2.f32 %v370_v24  ;;  %v414_v56 = vcvt.s32.f32 (!%p2152_p13), %v412_v54  ;;  %v415_v61 = vcvt.s32.f32 (!%p2152_p13), %v413_v58  ;;  %v419_v5 = vstv (!%p2152_p13), %s2153_s25 }
  0xdd   : > { %1076 = vpow2.f32 %v372_v25  ;;  %v418_v57 = vcvt.s32.f32 (!%p2152_p13), %v417_v55  ;;  %v432_v8 = vstv (!%p2152_p13), %s431_s29  ;;  %vm420_vm8 = vcmp.ge.s32.totalorder (!%p2152_p13), %v1766_v11, %v419_v5 }
  0xde   : > { %1078 = vpow2.f32 %v382_v26  ;;  %v435_v59 = vmul.f32 (!%p2152_p13), %v414_v56, %v414_v56  ;;  %v436_v0 = vmul.f32 (!%p2152_p13), %v415_v61, %v415_v61  ;;  %vm424_vm9 = vcmp.lt.s32.totalorder (!%p2152_p13), %v1766_v11, %v423_v6 }
  0xdf   : > { %1080 = vpow2.f32 %v384_v27  ;;  %v445_v60 = vmul.f32 (!%p2152_p13), %v418_v57, %v418_v57  ;;  %vm430_vm10 = vcmp.ge.s32.totalorder (!%p2152_p13), %v1768_v12, %v429_v7  ;;  %vm433_vm11 = vcmp.lt.s32.totalorder (!%p2152_p13), %v1768_v12, %v432_v8  ;;  %vm426_vm12 = vmand (!%p2152_p13), %vm420_vm8, %vm424_vm9 }
  0xe0   : > { %v437_v62 = vmul.f32 (!%p2152_p13), -0.055555556, %v435_v59  ;;  %v438_v3 = vmul.f32 (!%p2152_p13), -0.055555556, %v436_v0  ;;  %vm421_vm13 = vcmp.ge.s32.totalorder (!%p2152_p13), %v1771_v15, %v419_v5  ;;  %vm425_vm14 = vcmp.lt.s32.totalorder (!%p2152_p13), %v1771_v15, %v423_v6  ;;  %vm434_vm15 = vmand (!%p2152_p13), %vm430_vm10, %vm433_vm11 }
  0xe1   : > { %v446_v63 = vmul.f32 (!%p2152_p13), -0.055555556, %v445_v60  ;;  %v454_v9 = vstv (!%p2152_p13), %s1525_s30 }
  0xe2   : > { %v439_v1 = vmul.f32 (!%p2152_p13), 1.442695, %v437_v62  ;;  %v441_v4 = vmul.f32 (!%p2152_p13), 1.442695, %v438_v3 }
  0xe3   : > { %v447_v2 = vmul.f32 (!%p2152_p13), 1.442695, %v446_v63 }
  0xe4   : > { %v1071_v28 = vpop.eup %1070 }
  0xe5   : > { %v1073_v29 = vpop.eup %1072  ;;  %v366_v40 = vsel %vm364_vm2, %v1071_v28, 0.0  ;;  %vm427_vm2 = vmand (!%p2152_p13), %vm421_vm13, %vm425_vm14 }
  0xe6   : > { %v1075_v30 = vpop.eup %1074  ;;  %v367_v41 = vsel %vm365_vm3, %v1073_v29, 0.0  ;;  %vm455_vm3 = vcmp.eq.s32.totalorder (!%p2152_p13), %v1774_v32, %v454_v9 }
  0xe7   : > { %v1077_v31 = vpop.eup %1076  ;;  %v374_v33 = vadd.f32 %v1075_v30, %v1071_v28  ;;  %v378_v42 = vsel %vm376_vm4, %v1075_v30, %v366_v40  ;;  %vm456_vm4 = vcmp.eq.s32.totalorder (!%p2152_p13), %v1777_v35, %v454_v9 }
  0xe8   : > { %v1079_v34 = vpop.eup %1078  ;;  %v375_v36 = vadd.f32 %v1077_v31, %v1073_v29  ;;  %v379_v43 = vsel %vm377_vm5, %v1077_v31, %v367_v41 }
  0xe9   : > { %v1081_v37 = vpop.eup %1080  ;;  %v386_v38 = vadd.f32 %v1079_v34, %v374_v33  ;;  %v390_v44 = vsel %vm388_vm6, %v1079_v34, %v378_v42 }
  0xea   : > { %v387_v39 = vadd.f32 %v1081_v37, %v375_v36  ;;  %v391_v45 = vsel %vm389_vm7, %v1081_v37, %v379_v43 }
  0xeb   : > { %1082 = vrcp.f32 %v386_v38 }
  0xec   : > { %1084 = vrcp.f32 %v387_v39 }
  0xed   : > { %1086 = vpow2.f32 (!%p2152_p13), %v439_v1 }
  0xee   : > { %1088 = vpow2.f32 (!%p2152_p13), %v447_v2 }
  0xef   : > { %1090 = vpow2.f32 (!%p2152_p13), %v441_v4 }
  0xf3   : > { %410 = sbr.rel (%p2152_p13) target bundleno = 257 (0x101), region = 44 }
  0xf5   : > { %v1083_v46 = vpop.eup %1082 }
  0xf6   : > { %v1085_v47 = vpop.eup %1084  ;;  %v1785_v48 = vmul.f32 %v1083_v46, %v390_v44 }
  0xf7   : > { %v1787_v49 = vmul.f32 %v1085_v47, %v391_v45  ;;  %v1087_v10 = vpop.eup (!%p2152_p13), %1086 }
  0xf8   : > { %v396_v50 = vsub.f32 1.5514448, %v1785_v48  ;;  %v1089_v13 = vpop.eup (!%p2152_p13), %1088  ;;  %v443_v14 = vsel (!%p2152_p13), %vm426_vm12, %v1087_v10, 0.0 }
  0xf9   : > { %v397_v51 = vsub.f32 1.5514448, %v1787_v49  ;;  %v449_v16 = vsel (!%p2152_p13), %vm434_vm15, %v1089_v13, 0.0  ;;  %v1091_v17 = vpop.eup (!%p2152_p13), %1090 }
  0xfa   : > { %v450_v18 = vmul.f32 %v449_v16, %v443_v14  ;;  %v444_v20 = vsel %vm427_vm2, %v1091_v17, 0.0 }
  0xfb   : > { %v451_v22 = vmul.f32 %v449_v16, %v444_v20 }
  0xfc   : > { %v457_v21 = vsel %vm455_vm3, %v450_v18, 0.0 }
  0xfd   : > { %v459_v24 = vadd.f32 %v457_v21, %v452_v19  ;;  %v458_v25 = vsel %vm456_vm4, %v451_v22, 0.0 }
  0xfe   : > { %v460_v26 = vadd.f32 %v458_v25, %v453_v23 }
  0xff   : > { %461 = vst.msk [vmem:[#allocation2] sm:$0xff] %vm406_vm1, %v459_v24 }
 0x100   : > { %462 = vst.msk [vmem:[#allocation2 + $0x8] sm:$0xff] %vm406_vm1, %v460_v26 }
 0x101 PF: > { %p2154_p8 = scmp.ne.s32.totalorder %s2114_s20, 0  ;;  %p2155_p9 = scmp.ne.s32.totalorder %s2113_s22, 0 }
 0x103   : > { %p2156_p7 = pnand %p2154_p8, %p2155_p9 }
 0x104   : > { %v465_v27 = vstv (!%p2156_p7), %s1486_s0  ;;  %v470_v28 = vstv (!%p2156_p7), %s1504_s27  ;;  %s476_s30 = sadd.s32 (!%p2156_p7), 5, %s1486_s0  ;;  %s989_s28 = sadd.s32 (!%p2156_p7), 4294967292, %s1504_s27  ;;  %v508_v54 = vstv (!%p2156_p7), %s1527_s1 }
 0x105   : > { %464 = sbr.rel (%p2156_p7) target bundleno = 291 (0x123), region = 48  ;;  %v466_v29 = vsub.s32 (!%p2156_p7), %v1766_v11, %v465_v27  ;;  %v471_v30 = vsub.s32 (!%p2156_p7), %v1768_v12, %v470_v28  ;;  %v467_v34 = vsub.s32 (!%p2156_p7), %v1771_v15, %v465_v27  ;;  %s485_s24 = sadd.s32 (!%p2156_p7), 4, %s1504_s27  ;;  %v477_v47 = vstv (!%p2156_p7), %s476_s30 }
 0x106   : > { %s2157_s12 = sadd.s32 (!%p2156_p7), 4294967292, %s1486_s0  ;;  %v483_v52 = vstv (!%p2156_p7), %s989_s28  ;;  %v486_v53 = vstv (!%p2156_p7), %s485_s24  ;;  %vm478_vm6 = vcmp.lt.s32.totalorder (!%p2156_p7), %v1766_v11, %v477_v47  ;;  %vm479_vm11 = vcmp.lt.s32.totalorder (!%p2156_p7), %v1771_v15, %v477_v47  ;;  %v506_v61 = vld [vmem:[#allocation2] sm:$0xff] (!%p2156_p7) }
 0x107   : > { %v468_v31 = vcvt.s32.f32 (!%p2156_p7), %v466_v29  ;;  %v472_v33 = vcvt.s32.f32 (!%p2156_p7), %v471_v30  ;;  %v469_v38 = vcvt.s32.f32 (!%p2156_p7), %v467_v34  ;;  %v473_v46 = vstv (!%p2156_p7), %s2157_s12  ;;  %v507_v1 = vld [vmem:[#allocation2 + $0x8] sm:$0xff] (!%p2156_p7) }
 0x108   : > { %vm474_vm5 = vcmp.ge.s32.totalorder (!%p2156_p7), %v1766_v11, %v473_v46  ;;  %vm484_vm7 = vcmp.ge.s32.totalorder (!%p2156_p7), %v1768_v12, %v483_v52  ;;  %vm487_vm8 = vcmp.lt.s32.totalorder (!%p2156_p7), %v1768_v12, %v486_v53  ;;  %vm475_vm10 = vcmp.ge.s32.totalorder (!%p2156_p7), %v1771_v15, %v473_v46 }
 0x109   : > { %v489_v36 = vmul.f32 (!%p2156_p7), %v468_v31, %v468_v31  ;;  %v499_v37 = vmul.f32 (!%p2156_p7), %v472_v33, %v472_v33  ;;  %v490_v41 = vmul.f32 (!%p2156_p7), %v469_v38, %v469_v38  ;;  %vm480_vm9 = vmand (!%p2156_p7), %vm474_vm5, %vm478_vm6  ;;  %vm509_vm14 = vcmp.eq.s32.totalorder (!%p2156_p7), %v1774_v32, %v508_v54 }
 0x10a   : > { %vm488_vm12 = vmand (!%p2156_p7), %vm484_vm7, %vm487_vm8  ;;  %vm510_vm15 = vcmp.eq.s32.totalorder (!%p2156_p7), %v1777_v35, %v508_v54 }
 0x10b   : > { %v491_v39 = vmul.f32 (!%p2156_p7), -0.055555556, %v489_v36  ;;  %v500_v40 = vmul.f32 (!%p2156_p7), -0.055555556, %v499_v37  ;;  %v492_v44 = vmul.f32 (!%p2156_p7), -0.055555556, %v490_v41  ;;  %vm481_vm13 = vmand (!%p2156_p7), %vm475_vm10, %vm479_vm11 }
 0x10d   : > { %v493_v42 = vmul.f32 1.442695, %v491_v39  ;;  %v501_v43 = vmul.f32 1.442695, %v500_v40  ;;  %v495_v45 = vmul.f32 1.442695, %v492_v44 }
 0x10f   : > { %1092 = vpow2.f32 %v493_v42 }
 0x110   : > { %1094 = vpow2.f32 %v501_v43 }
 0x111   : > { %1096 = vpow2.f32 %v495_v45 }
 0x119   : > { %v1093_v55 = vpop.eup %1092 }
 0x11a   : > { %v1095_v56 = vpop.eup %1094  ;;  %v497_v57 = vsel %vm480_vm9, %v1093_v55, 0.0 }
 0x11b   : > { %v503_v58 = vsel %vm488_vm12, %v1095_v56, 0.0  ;;  %v1097_v59 = vpop.eup %1096 }
 0x11c   : > { %v504_v60 = vmul.f32 %v503_v58, %v497_v57  ;;  %v498_v62 = vsel %vm481_vm13, %v1097_v59, 0.0 }
 0x11d   : > { %v505_v0 = vmul.f32 %v503_v58, %v498_v62 }
 0x11e   : > { %v511_v63 = vsel %vm509_vm14, %v504_v60, 0.0 }
 0x11f   : > { %v513_v2 = vadd.f32 %v511_v63, %v506_v61  ;;  %v512_v3 = vsel %vm510_vm15, %v505_v0, 0.0 }
 0x120   : > { %v514_v4 = vadd.f32 %v512_v3, %v507_v1 }
 0x121   : > { %515 = vst.msk [vmem:[#allocation2] sm:$0xff] %vm406_vm1, %v513_v2 }
 0x122   : > { %516 = vst.msk [vmem:[#allocation2 + $0x8] sm:$0xff] %vm406_vm1, %v514_v4 }
 0x123 PF: > { %s2158_s1 = sld [smem:[#allocation36_spill]]  ;;  %s2160_s0 = sld [smem:[#allocation35_spill]] }
 0x129   : > { %p2159_p0 = scmp.ne.s32.totalorder %s2158_s1, 0  ;;  %p2161_p1 = scmp.ne.s32.totalorder %s2160_s0, 0 }
 0x12b   : > { %p2162_p6 = pnand %p2159_p0, %p2161_p1 }
 0x12c   : > { %s2163_s27 = sld [smem:[#allocation19_spill]] (!%p2162_p6)  ;;  %s2164_s26 = sld [smem:[#allocation23_spill]] (!%p2162_p6)  ;;  %v560_v38 = vld [vmem:[#allocation2] sm:$0xff] (!%p2162_p6)  ;;  %v561_v42 = vld [vmem:[#allocation2 + $0x8] sm:$0xff] (!%p2162_p6) }
 0x12d   : > { %518 = sbr.rel (%p2162_p6) target bundleno = 337 (0x151), region = 52  ;;  %s2165_s19 = sld [smem:[#allocation29_spill]] (!%p2162_p6) }
 0x132   : > { %v519_v5 = vstv (!%p2162_p6), %s2163_s27  ;;  %v524_v6 = vstv (!%p2162_p6), %s2164_s26  ;;  %s530_s22 = sadd.s32 (!%p2162_p6), 5, %s2163_s27  ;;  %s990_s20 = sadd.s32 (!%p2162_p6), 4294967292, %s2164_s26 }
 0x133   : > { %v520_v7 = vsub.s32 (!%p2162_p6), %v1766_v11, %v519_v5  ;;  %v525_v8 = vsub.s32 (!%p2162_p6), %v1768_v12, %v524_v6  ;;  %v521_v13 = vsub.s32 (!%p2162_p6), %v1771_v15, %v519_v5  ;;  %s539_s6 = sadd.s32 (!%p2162_p6), 4, %s2164_s26  ;;  %s2166_s21 = sadd.s32 (!%p2162_p6), 4294967292, %s2163_s27  ;;  %v531_v26 = vstv (!%p2162_p6), %s530_s22 }
 0x134   : > { %v527_v25 = vstv %s2166_s21  ;;  %v537_v27 = vstv %s990_s20  ;;  %v540_v28 = vstv %s539_s6  ;;  %vm532_vm3 = vcmp.lt.s32.totalorder %v1766_v11, %v531_v26 }
 0x135   : > { %v522_v9 = vcvt.s32.f32 %v520_v7  ;;  %v526_v10 = vcvt.s32.f32 %v525_v8  ;;  %v523_v17 = vcvt.s32.f32 %v521_v13  ;;  %vm528_vm2 = vcmp.ge.s32.totalorder %v1766_v11, %v527_v25 }
 0x136   : > { %vm538_vm4 = vcmp.ge.s32.totalorder %v1768_v12, %v537_v27  ;;  %vm541_vm5 = vcmp.lt.s32.totalorder %v1768_v12, %v540_v28  ;;  %vm534_vm6 = vmand %vm528_vm2, %vm532_vm3  ;;  %vm529_vm7 = vcmp.ge.s32.totalorder %v1771_v15, %v527_v25  ;;  %vm533_vm8 = vcmp.lt.s32.totalorder %v1771_v15, %v531_v26 }
 0x137   : > { %v543_v14 = vmul.f32 %v522_v9, %v522_v9  ;;  %v553_v16 = vmul.f32 %v526_v10, %v526_v10  ;;  %v544_v20 = vmul.f32 %v523_v17, %v523_v17  ;;  %vm542_vm9 = vmand %vm538_vm4, %vm541_vm5  ;;  %v562_v29 = vstv %s2165_s19 }
 0x138   : > { %vm535_vm10 = vmand %vm529_vm7, %vm533_vm8  ;;  %vm563_vm11 = vcmp.eq.s32.totalorder %v1774_v32, %v562_v29  ;;  %vm564_vm12 = vcmp.eq.s32.totalorder %v1777_v35, %v562_v29 }
 0x139   : > { %v545_v18 = vmul.f32 -0.055555556, %v543_v14  ;;  %v554_v19 = vmul.f32 -0.055555556, %v553_v16  ;;  %v546_v23 = vmul.f32 -0.055555556, %v544_v20 }
 0x13b   : > { %v547_v21 = vmul.f32 1.442695, %v545_v18  ;;  %v555_v22 = vmul.f32 1.442695, %v554_v19  ;;  %v549_v24 = vmul.f32 1.442695, %v546_v23 }
 0x13d   : > { %1098 = vpow2.f32 %v547_v21 }
 0x13e   : > { %1100 = vpow2.f32 %v555_v22 }
 0x13f   : > { %1102 = vpow2.f32 %v549_v24 }
 0x147   : > { %v1099_v30 = vpop.eup %1098 }
 0x148   : > { %v1101_v31 = vpop.eup %1100  ;;  %v551_v33 = vsel %vm534_vm6, %v1099_v30, 0.0 }
 0x149   : > { %v557_v34 = vsel %vm542_vm9, %v1101_v31, 0.0  ;;  %v1103_v36 = vpop.eup %1102 }
 0x14a   : > { %v558_v37 = vmul.f32 %v557_v34, %v551_v33  ;;  %v552_v39 = vsel %vm535_vm10, %v1103_v36, 0.0 }
 0x14b   : > { %v559_v41 = vmul.f32 %v557_v34, %v552_v39 }
 0x14c   : > { %v565_v40 = vsel %vm563_vm11, %v558_v37, 0.0 }
 0x14d   : > { %v567_v43 = vadd.f32 %v565_v40, %v560_v38  ;;  %v566_v44 = vsel %vm564_vm12, %v559_v41, 0.0 }
 0x14e   : > { %v568_v45 = vadd.f32 %v566_v44, %v561_v42 }
 0x14f   : > { %569 = vst.msk [vmem:[#allocation2] sm:$0xff] %vm406_vm1, %v567_v43 }
 0x150   : > { %570 = vst.msk [vmem:[#allocation2 + $0x8] sm:$0xff] %vm406_vm1, %v568_v45 }
 0x151 PF: > { %s2167_s5 = sld [smem:[#allocation38_spill]]  ;;  %s2169_s23 = sld [smem:[#allocation37_spill]] }
 0x157   : > { %p2168_p4 = scmp.ne.s32.totalorder %s2167_s5, 0  ;;  %p2170_p12 = scmp.ne.s32.totalorder %s2169_s23, 0 }
 0x159   : > { %p2171_p10 = pnand %p2168_p4, %p2170_p12 }
 0x15a   : > { %s2172_s29 = sld [smem:[#allocation20_spill]] (!%p2171_p10)  ;;  %s2173_s25 = sld [smem:[#allocation24_spill]] (!%p2171_p10)  ;;  %v614_v17 = vld [vmem:[#allocation2] sm:$0xff] (!%p2171_p10)  ;;  %v615_v21 = vld [vmem:[#allocation2 + $0x8] sm:$0xff] (!%p2171_p10) }
 0x15b   : > { %572 = sbr.rel (%p2171_p10) target bundleno = 383 (0x17f), region = 56  ;;  %s2174_s12 = sld [smem:[#allocation30_spill]] (!%p2171_p10) }
 0x160   : > { %v573_v46 = vstv (!%p2171_p10), %s2172_s29  ;;  %v578_v47 = vstv (!%p2171_p10), %s2173_s25  ;;  %s584_s30 = sadd.s32 (!%p2171_p10), 5, %s2172_s29  ;;  %s991_s28 = sadd.s32 (!%p2171_p10), 4294967292, %s2173_s25 }
 0x161   : > { %v574_v52 = vsub.s32 (!%p2171_p10), %v1766_v11, %v573_v46  ;;  %v579_v53 = vsub.s32 (!%p2171_p10), %v1768_v12, %v578_v47  ;;  %v575_v56 = vsub.s32 (!%p2171_p10), %v1771_v15, %v573_v46  ;;  %s593_s24 = sadd.s32 (!%p2171_p10), 4, %s2173_s25  ;;  %s2175_s1 = sadd.s32 (!%p2171_p10), 4294967292, %s2172_s29  ;;  %v585_v4 = vstv (!%p2171_p10), %s584_s30 }
 0x162   : > { %v581_v3 = vstv %s2175_s1  ;;  %v591_v5 = vstv %s991_s28  ;;  %v594_v6 = vstv %s593_s24  ;;  %vm586_vm14 = vcmp.lt.s32.totalorder %v1766_v11, %v585_v4 }
 0x163   : > { %v576_v54 = vcvt.s32.f32 %v574_v52  ;;  %v580_v55 = vcvt.s32.f32 %v579_v53  ;;  %v577_v59 = vcvt.s32.f32 %v575_v56  ;;  %vm582_vm13 = vcmp.ge.s32.totalorder %v1766_v11, %v581_v3 }
 0x164   : > { %vm592_vm15 = vcmp.ge.s32.totalorder %v1768_v12, %v591_v5  ;;  %vm595_vm2 = vcmp.lt.s32.totalorder %v1768_v12, %v594_v6  ;;  %vm588_vm3 = vmand %vm582_vm13, %vm586_vm14  ;;  %vm583_vm4 = vcmp.ge.s32.totalorder %v1771_v15, %v581_v3  ;;  %vm587_vm5 = vcmp.lt.s32.totalorder %v1771_v15, %v585_v4 }
 0x165   : > { %v597_v57 = vmul.f32 %v576_v54, %v576_v54  ;;  %v607_v58 = vmul.f32 %v580_v55, %v580_v55  ;;  %v598_v62 = vmul.f32 %v577_v59, %v577_v59  ;;  %vm596_vm6 = vmand %vm592_vm15, %vm595_vm2  ;;  %v616_v7 = vstv %s2174_s12 }
 0x166   : > { %vm589_vm7 = vmand %vm583_vm4, %vm587_vm5  ;;  %vm617_vm8 = vcmp.eq.s32.totalorder %v1774_v32, %v616_v7  ;;  %vm618_vm9 = vcmp.eq.s32.totalorder %v1777_v35, %v616_v7 }
 0x167   : > { %v599_v60 = vmul.f32 -0.055555556, %v597_v57  ;;  %v608_v61 = vmul.f32 -0.055555556, %v607_v58  ;;  %v600_v1 = vmul.f32 -0.055555556, %v598_v62 }
 0x169   : > { %v601_v63 = vmul.f32 1.442695, %v599_v60  ;;  %v609_v0 = vmul.f32 1.442695, %v608_v61  ;;  %v603_v2 = vmul.f32 1.442695, %v600_v1 }
 0x16b   : > { %1104 = vpow2.f32 %v601_v63 }
 0x16c   : > { %1106 = vpow2.f32 %v609_v0 }
 0x16d   : > { %1108 = vpow2.f32 %v603_v2 }
 0x175   : > { %v1105_v8 = vpop.eup %1104 }
 0x176   : > { %v1107_v9 = vpop.eup %1106  ;;  %v605_v10 = vsel %vm588_vm3, %v1105_v8, 0.0 }
 0x177   : > { %v611_v13 = vsel %vm596_vm6, %v1107_v9, 0.0  ;;  %v1109_v14 = vpop.eup %1108 }
 0x178   : > { %v612_v16 = vmul.f32 %v611_v13, %v605_v10  ;;  %v606_v18 = vsel %vm589_vm7, %v1109_v14, 0.0 }
 0x179   : > { %v613_v20 = vmul.f32 %v611_v13, %v606_v18 }
 0x17a   : > { %v619_v19 = vsel %vm617_vm8, %v612_v16, 0.0 }
 0x17b   : > { %v621_v22 = vadd.f32 %v619_v19, %v614_v17  ;;  %v620_v23 = vsel %vm618_vm9, %v613_v20, 0.0 }
 0x17c   : > { %v622_v24 = vadd.f32 %v620_v23, %v615_v21 }
 0x17d   : > { %623 = vst.msk [vmem:[#allocation2] sm:$0xff] %vm406_vm1, %v621_v22 }
 0x17e   : > { %624 = vst.msk [vmem:[#allocation2 + $0x8] sm:$0xff] %vm406_vm1, %v622_v24 }
 0x17f PF: > { %p2176_p5 = scmp.ne.s32.totalorder %s2128_s8, 0  ;;  %p2177_p2 = scmp.ne.s32.totalorder %s2126_s7, 0 }
 0x181   : > { %p2178_p11 = pnand %p2176_p5, %p2177_p2 }
 0x182   : > { %s2179_s0 = sld [smem:[#allocation21_spill]] (!%p2178_p11)  ;;  %s2180_s27 = sld [smem:[#allocation25_spill]] (!%p2178_p11) }
 0x183   : > { %626 = sbr.rel (%p2178_p11) target bundleno = 423 (0x1a7), region = 60  ;;  %s2181_s22 = sld [smem:[#allocation31_spill]] (!%p2178_p11) }
 0x184   : > { %v668_v59 = vld [vmem:[#allocation2] sm:$0xff] (!%p2178_p11) }
 0x185   : > { %v669_v63 = vld [vmem:[#allocation2 + $0x8] sm:$0xff] (!%p2178_p11) }
 0x188   : > { %v627_v25 = vstv (!%p2178_p11), %s2179_s0  ;;  %v632_v26 = vstv (!%p2178_p11), %s2180_s27  ;;  %s638_s8 = sadd.s32 (!%p2178_p11), 5, %s2179_s0  ;;  %s992_s7 = sadd.s32 (!%p2178_p11), 4294967292, %s2180_s27 }
 0x189   : > { %v628_v27 = vsub.s32 (!%p2178_p11), %v1766_v11, %v627_v25  ;;  %v633_v28 = vsub.s32 (!%p2178_p11), %v1768_v12, %v632_v26  ;;  %v629_v31 = vsub.s32 (!%p2178_p11), %v1771_v15, %v627_v25  ;;  %s647_s26 = sadd.s32 (!%p2178_p11), 4, %s2180_s27  ;;  %s2182_s20 = sadd.s32 (!%p2178_p11), 4294967292, %s2179_s0  ;;  %v639_v45 = vstv (!%p2178_p11), %s638_s8 }
 0x18a   : > { %v635_v44 = vstv %s2182_s20  ;;  %v645_v46 = vstv %s992_s7  ;;  %v648_v47 = vstv %s647_s26  ;;  %vm640_vm11 = vcmp.lt.s32.totalorder %v1766_v11, %v639_v45 }
 0x18b   : > { %v630_v29 = vcvt.s32.f32 %v628_v27  ;;  %v634_v30 = vcvt.s32.f32 %v633_v28  ;;  %v631_v36 = vcvt.s32.f32 %v629_v31  ;;  %vm636_vm10 = vcmp.ge.s32.totalorder %v1766_v11, %v635_v44 }
 0x18c   : > { %vm646_vm12 = vcmp.ge.s32.totalorder %v1768_v12, %v645_v46  ;;  %vm649_vm13 = vcmp.lt.s32.totalorder %v1768_v12, %v648_v47  ;;  %vm642_vm14 = vmand %vm636_vm10, %vm640_vm11  ;;  %vm637_vm15 = vcmp.ge.s32.totalorder %v1771_v15, %v635_v44  ;;  %vm641_vm2 = vcmp.lt.s32.totalorder %v1771_v15, %v639_v45 }
 0x18d   : > { %v651_v33 = vmul.f32 %v630_v29, %v630_v29  ;;  %v661_v34 = vmul.f32 %v634_v30, %v634_v30  ;;  %v652_v39 = vmul.f32 %v631_v36, %v631_v36  ;;  %vm650_vm3 = vmand %vm646_vm12, %vm649_vm13  ;;  %v670_v52 = vstv %s2181_s22 }
 0x18e   : > { %vm643_vm4 = vmand %vm637_vm15, %vm641_vm2  ;;  %vm671_vm5 = vcmp.eq.s32.totalorder %v1774_v32, %v670_v52  ;;  %vm672_vm6 = vcmp.eq.s32.totalorder %v1777_v35, %v670_v52 }
 0x18f   : > { %v653_v37 = vmul.f32 -0.055555556, %v651_v33  ;;  %v662_v38 = vmul.f32 -0.055555556, %v661_v34  ;;  %v654_v42 = vmul.f32 -0.055555556, %v652_v39 }
 0x191   : > { %v655_v40 = vmul.f32 1.442695, %v653_v37  ;;  %v663_v41 = vmul.f32 1.442695, %v662_v38  ;;  %v657_v43 = vmul.f32 1.442695, %v654_v42 }
 0x193   : > { %1110 = vpow2.f32 %v655_v40 }
 0x194   : > { %1112 = vpow2.f32 %v663_v41 }
 0x195   : > { %1114 = vpow2.f32 %v657_v43 }
 0x19d   : > { %v1111_v53 = vpop.eup %1110 }
 0x19e   : > { %v1113_v54 = vpop.eup %1112  ;;  %v659_v55 = vsel %vm642_vm14, %v1111_v53, 0.0 }
 0x19f   : > { %v665_v56 = vsel %vm650_vm3, %v1113_v54, 0.0  ;;  %v1115_v57 = vpop.eup %1114 }
 0x1a0   : > { %v666_v58 = vmul.f32 %v665_v56, %v659_v55  ;;  %v660_v60 = vsel %vm643_vm4, %v1115_v57, 0.0 }
 0x1a1   : > { %v667_v62 = vmul.f32 %v665_v56, %v660_v60 }
 0x1a2   : > { %v673_v61 = vsel %vm671_vm5, %v666_v58, 0.0 }
 0x1a3   : > { %v675_v0 = vadd.f32 %v673_v61, %v668_v59  ;;  %v674_v1 = vsel %vm672_vm6, %v667_v62, 0.0 }
 0x1a4   : > { %v676_v2 = vadd.f32 %v674_v1, %v669_v63 }
 0x1a5   : > { %677 = vst.msk [vmem:[#allocation2] sm:$0xff] %vm406_vm1, %v675_v0 }
 0x1a6   : > { %678 = vst.msk [vmem:[#allocation2 + $0x8] sm:$0xff] %vm406_vm1, %v676_v2 }
 0x1a7 PF: > { %p2183_p13 = scmp.ne.s32.totalorder %s2133_s3, 0  ;;  %p2184_p8 = scmp.ne.s32.totalorder %s2131_s11, 0 }
 0x1a9   : > { %p2185_p9 = pnand %p2183_p13, %p2184_p8 }
 0x1aa   : > { %s2186_s6 = sld [smem:[#allocation22_spill]] (!%p2185_p9)  ;;  %s2187_s19 = sld [smem:[#allocation26_spill]] (!%p2185_p9) }
 0x1ab   : > { %680 = sbr.rel (%p2185_p9) target bundleno = 463 (0x1cf), region = 64  ;;  %s2188_s5 = sld [smem:[#allocation32_spill]] (!%p2185_p9) }
 0x1ac   : > { %v722_v36 = vld [vmem:[#allocation2] sm:$0xff] (!%p2185_p9) }
 0x1ad   : > { %v723_v40 = vld [vmem:[#allocation2 + $0x8] sm:$0xff] (!%p2185_p9) }
 0x1b0   : > { %v681_v3 = vstv (!%p2185_p9), %s2186_s6  ;;  %v686_v4 = vstv (!%p2185_p9), %s2187_s19  ;;  %s692_s11 = sadd.s32 (!%p2185_p9), 5, %s2186_s6  ;;  %s993_s3 = sadd.s32 (!%p2185_p9), 4294967292, %s2187_s19 }
 0x1b1   : > { %v682_v5 = vsub.s32 (!%p2185_p9), %v1766_v11, %v681_v3  ;;  %v687_v6 = vsub.s32 (!%p2185_p9), %v1768_v12, %v686_v4  ;;  %v683_v9 = vsub.s32 (!%p2185_p9), %v1771_v15, %v681_v3  ;;  %s701_s21 = sadd.s32 (!%p2185_p9), 4, %s2187_s19  ;;  %s2189_s23 = sadd.s32 (!%p2185_p9), 4294967292, %s2186_s6  ;;  %v693_v24 = vstv (!%p2185_p9), %s692_s11 }
 0x1b2   : > { %v689_v23 = vstv %s2189_s23  ;;  %v699_v25 = vstv %s993_s3  ;;  %v702_v26 = vstv %s701_s21  ;;  %vm694_vm8 = vcmp.lt.s32.totalorder %v1766_v11, %v693_v24 }
 0x1b3   : > { %v684_v7 = vcvt.s32.f32 %v682_v5  ;;  %v688_v8 = vcvt.s32.f32 %v687_v6  ;;  %v685_v14 = vcvt.s32.f32 %v683_v9  ;;  %vm690_vm7 = vcmp.ge.s32.totalorder %v1766_v11, %v689_v23 }
 0x1b4   : > { %vm700_vm9 = vcmp.ge.s32.totalorder %v1768_v12, %v699_v25  ;;  %vm703_vm10 = vcmp.lt.s32.totalorder %v1768_v12, %v702_v26  ;;  %vm696_vm11 = vmand %vm690_vm7, %vm694_vm8  ;;  %vm691_vm12 = vcmp.ge.s32.totalorder %v1771_v15, %v689_v23  ;;  %vm695_vm13 = vcmp.lt.s32.totalorder %v1771_v15, %v693_v24 }
 0x1b5   : > { %v705_v10 = vmul.f32 %v684_v7, %v684_v7  ;;  %v715_v13 = vmul.f32 %v688_v8, %v688_v8  ;;  %v706_v18 = vmul.f32 %v685_v14, %v685_v14  ;;  %vm704_vm14 = vmand %vm700_vm9, %vm703_vm10  ;;  %v724_v27 = vstv %s2188_s5 }
 0x1b6   : > { %vm697_vm15 = vmand %vm691_vm12, %vm695_vm13  ;;  %vm725_vm2 = vcmp.eq.s32.totalorder %v1774_v32, %v724_v27  ;;  %vm726_vm3 = vcmp.eq.s32.totalorder %v1777_v35, %v724_v27 }
 0x1b7   : > { %v707_v16 = vmul.f32 -0.055555556, %v705_v10  ;;  %v716_v17 = vmul.f32 -0.055555556, %v715_v13  ;;  %v708_v21 = vmul.f32 -0.055555556, %v706_v18 }
 0x1b9   : > { %v709_v19 = vmul.f32 1.442695, %v707_v16  ;;  %v717_v20 = vmul.f32 1.442695, %v716_v17  ;;  %v711_v22 = vmul.f32 1.442695, %v708_v21 }
 0x1bb   : > { %1116 = vpow2.f32 %v709_v19 }
 0x1bc   : > { %1118 = vpow2.f32 %v717_v20 }
 0x1bd   : > { %1120 = vpow2.f32 %v711_v22 }
 0x1c5   : > { %v1117_v28 = vpop.eup %1116 }
 0x1c6   : > { %v1119_v29 = vpop.eup %1118  ;;  %v713_v30 = vsel %vm696_vm11, %v1117_v28, 0.0 }
 0x1c7   : > { %v719_v31 = vsel %vm704_vm14, %v1119_v29, 0.0  ;;  %v1121_v33 = vpop.eup %1120 }
 0x1c8   : > { %v720_v34 = vmul.f32 %v719_v31, %v713_v30  ;;  %v714_v37 = vsel %vm697_vm15, %v1121_v33, 0.0 }
 0x1c9   : > { %v721_v39 = vmul.f32 %v719_v31, %v714_v37 }
 0x1ca   : > { %v727_v38 = vsel %vm725_vm2, %v720_v34, 0.0 }
 0x1cb   : > { %v729_v41 = vadd.f32 %v727_v38, %v722_v36  ;;  %v728_v42 = vsel %vm726_vm3, %v721_v39, 0.0 }
 0x1cc   : > { %v730_v43 = vadd.f32 %v728_v42, %v723_v40 }
 0x1cd   : > { %731 = vst.msk [vmem:[#allocation2] sm:$0xff] %vm406_vm1, %v729_v41 }
 0x1ce   : > { %732 = vst.msk [vmem:[#allocation2 + $0x8] sm:$0xff] %vm406_vm1, %v730_v43 }
 0x1cf PF: > { %p2190_p7 = scmp.ne.s32.totalorder %s2135_s14, 0  ;;  %p2191_p0 = scmp.ne.s32.totalorder %s2134_s10, 0 }
 0x1d1   : > { %p2192_p1 = pnand %p2190_p7, %p2191_p0 }
 0x1d2   : > { %s2193_s29 = sld [smem:[#allocation27_spill]] (!%p2192_p1)  ;;  %v735_v44 = vstv (!%p2192_p1), %s1572_s13  ;;  %s746_s10 = sadd.s32 (!%p2192_p1), 5, %s1572_s13  ;;  %v743_v1 = vstv (!%p2192_p1), %s982_s15 }
 0x1d3   : > { %734 = sbr.rel (%p2192_p1) target bundleno = 502 (0x1f6), region = 68  ;;  %v736_v46 = vsub.s32 (!%p2192_p1), %v1766_v11, %v735_v44  ;;  %v737_v54 = vsub.s32 (!%p2192_p1), %v1771_v15, %v735_v44  ;;  %s2194_s30 = sld [smem:[#allocation33_spill]] (!%p2192_p1)  ;;  %v747_v2 = vstv (!%p2192_p1), %s746_s10  ;;  %vm744_vm4 = vcmp.ge.s32.totalorder (!%p2192_p1), %v1766_v11, %v743_v1 }
 0x1d4   : > { %vm748_vm5 = vcmp.lt.s32.totalorder (!%p2192_p1), %v1766_v11, %v747_v2  ;;  %vm745_vm9 = vcmp.ge.s32.totalorder (!%p2192_p1), %v1771_v15, %v743_v1  ;;  %vm749_vm10 = vcmp.lt.s32.totalorder (!%p2192_p1), %v1771_v15, %v747_v2  ;;  %v776_v14 = vld [vmem:[#allocation2] sm:$0xff] (!%p2192_p1) }
 0x1d5   : > { %v738_v52 = vcvt.s32.f32 (!%p2192_p1), %v736_v46  ;;  %v739_v57 = vcvt.s32.f32 (!%p2192_p1), %v737_v54  ;;  %vm750_vm8 = vmand (!%p2192_p1), %vm744_vm4, %vm748_vm5  ;;  %v777_v19 = vld [vmem:[#allocation2 + $0x8] sm:$0xff] (!%p2192_p1) }
 0x1d6   : > { %vm751_vm12 = vmand (!%p2192_p1), %vm745_vm9, %vm749_vm10 }
 0x1d7   : > { %v759_v55 = vmul.f32 (!%p2192_p1), %v738_v52, %v738_v52  ;;  %v760_v60 = vmul.f32 (!%p2192_p1), %v739_v57, %v739_v57 }
 0x1d8   : > { %v740_v45 = vstv (!%p2192_p1), %s2193_s29  ;;  %s994_s14 = sadd.s32 (!%p2192_p1), 4294967292, %s2193_s29  ;;  %s755_s25 = sadd.s32 (!%p2192_p1), 4, %s2193_s29 }
 0x1d9   : > { %v741_v47 = vsub.s32 (!%p2192_p1), %v1768_v12, %v740_v45  ;;  %v761_v58 = vmul.f32 (!%p2192_p1), -0.055555556, %v759_v55  ;;  %v762_v63 = vmul.f32 (!%p2192_p1), -0.055555556, %v760_v60  ;;  %v753_v3 = vstv (!%p2192_p1), %s994_s14 }
 0x1da   : > { %v756_v4 = vstv %s755_s25  ;;  %vm754_vm6 = vcmp.ge.s32.totalorder %v1768_v12, %v753_v3  ;;  %v778_v5 = vstv %s2194_s30 }
 0x1db   : > { %v742_v53 = vcvt.s32.f32 %v741_v47  ;;  %v763_v61 = vmul.f32 1.442695, %v761_v58  ;;  %v765_v0 = vmul.f32 1.442695, %v762_v63  ;;  %vm757_vm7 = vcmp.lt.s32.totalorder %v1768_v12, %v756_v4 }
 0x1dc   : > { %vm758_vm11 = vmand %vm754_vm6, %vm757_vm7  ;;  %vm779_vm13 = vcmp.eq.s32.totalorder %v1774_v32, %v778_v5  ;;  %vm780_vm14 = vcmp.eq.s32.totalorder %v1777_v35, %v778_v5 }
 0x1dd   : > { %v769_v56 = vmul.f32 %v742_v53, %v742_v53  ;;  %1122 = vpow2.f32 %v763_v61 }
 0x1df   : > { %v770_v59 = vmul.f32 -0.055555556, %v769_v56 }
 0x1e1   : > { %v771_v62 = vmul.f32 1.442695, %v770_v59 }
 0x1e3   : > { %1124 = vpow2.f32 %v771_v62 }
 0x1e4   : > { %1126 = vpow2.f32 %v765_v0 }
 0x1e7   : > { %v1123_v6 = vpop.eup %1122 }
 0x1e8   : > { %v767_v8 = vsel %vm750_vm8, %v1123_v6, 0.0 }
 0x1ed   : > { %v1125_v7 = vpop.eup %1124 }
 0x1ee   : > { %v773_v9 = vsel %vm758_vm11, %v1125_v7, 0.0  ;;  %v1127_v10 = vpop.eup %1126 }
 0x1ef   : > { %v774_v13 = vmul.f32 %v773_v9, %v767_v8  ;;  %v768_v16 = vsel %vm751_vm12, %v1127_v10, 0.0 }
 0x1f0   : > { %v775_v18 = vmul.f32 %v773_v9, %v768_v16 }
 0x1f1   : > { %v781_v17 = vsel %vm779_vm13, %v774_v13, 0.0 }
 0x1f2   : > { %v783_v20 = vadd.f32 %v781_v17, %v776_v14  ;;  %v782_v21 = vsel %vm780_vm14, %v775_v18, 0.0 }
 0x1f3   : > { %v784_v22 = vadd.f32 %v782_v21, %v777_v19 }
 0x1f4   : > { %785 = vst.msk [vmem:[#allocation2] sm:$0xff] %vm406_vm1, %v783_v20 }
 0x1f5   : > { %786 = vst.msk [vmem:[#allocation2 + $0x8] sm:$0xff] %vm406_vm1, %v784_v22 }
 0x1f6 PF: > { %788 = sbr.rel (%p328_p3) target bundleno = 538 (0x21a), region = 72  ;;  %s2197_s13 = sld [smem:[#allocation28_spill]] (!%p328_p3)  ;;  %v789_v23 = vstv (!%p328_p3), %s1603_s16  ;;  %v797_v42 = vstv (!%p328_p3), %s983_s17 }
 0x1f7   : > { %v790_v25 = vsub.s32 (!%p328_p3), %v1766_v11, %v789_v23  ;;  %v791_v29 = vsub.s32 (!%p328_p3), %v1771_v15, %v789_v23  ;;  %s800_s9 = sadd.s32 (!%p328_p3), 5, %s1603_s16  ;;  %s2198_s28 = sld [smem:[#allocation34_spill]] (!%p328_p3)  ;;  %vm798_vm15 = vcmp.ge.s32.totalorder (!%p328_p3), %v1766_v11, %v797_v42  ;;  %vm799_vm6 = vcmp.ge.s32.totalorder (!%p328_p3), %v1771_v15, %v797_v42 }
 0x1f8   : > { %v801_v43 = vstv (!%p328_p3), %s800_s9 }
 0x1f9   : > { %v792_v27 = vcvt.s32.f32 (!%p328_p3), %v790_v25  ;;  %v793_v33 = vcvt.s32.f32 (!%p328_p3), %v791_v29  ;;  %vm802_vm2 = vcmp.lt.s32.totalorder (!%p328_p3), %v1766_v11, %v801_v43  ;;  %vm803_vm7 = vcmp.lt.s32.totalorder (!%p328_p3), %v1771_v15, %v801_v43 }
 0x1fa   : > { %vm804_vm5 = vmand (!%p328_p3), %vm798_vm15, %vm802_vm2 }
 0x1fb   : > { %v813_v30 = vmul.f32 (!%p328_p3), %v792_v27, %v792_v27  ;;  %v814_v37 = vmul.f32 (!%p328_p3), %v793_v33, %v793_v33  ;;  %vm805_vm9 = vmand (!%p328_p3), %vm799_vm6, %vm803_vm7  ;;  %v830_v56 = vld [vmem:[#allocation2] sm:$0xff] (!%p328_p3) }
 0x1fc   : > { %v794_v24 = vstv (!%p328_p3), %s2197_s13  ;;  %s995_s15 = sadd.s32 (!%p328_p3), 4294967292, %s2197_s13  ;;  %s809_s2 = sadd.s32 (!%p328_p3), 4, %s2197_s13  ;;  %v831_v59 = vld [vmem:[#allocation2 + $0x8] sm:$0xff] (!%p328_p3) }
 0x1fd   : > { %v795_v26 = vsub.s32 %v1768_v12, %v794_v24  ;;  %v815_v34 = vmul.f32 -0.055555556, %v813_v30  ;;  %v816_v40 = vmul.f32 -0.055555556, %v814_v37  ;;  %v807_v44 = vstv %s995_s15 }
 0x1fe   : > { %v810_v45 = vstv %s809_s2  ;;  %vm808_vm3 = vcmp.ge.s32.totalorder %v1768_v12, %v807_v44  ;;  %v832_v46 = vstv %s2198_s28 }
 0x1ff   : > { %v796_v28 = vcvt.s32.f32 %v795_v26  ;;  %v817_v38 = vmul.f32 1.442695, %v815_v34  ;;  %v819_v41 = vmul.f32 1.442695, %v816_v40  ;;  %vm811_vm4 = vcmp.lt.s32.totalorder %v1768_v12, %v810_v45 }
 0x200   : > { %vm812_vm8 = vmand %vm808_vm3, %vm811_vm4  ;;  %vm833_vm10 = vcmp.eq.s32.totalorder %v1774_v32, %v832_v46  ;;  %vm834_vm11 = vcmp.eq.s32.totalorder %v1777_v35, %v832_v46 }
 0x201   : > { %v823_v31 = vmul.f32 %v796_v28, %v796_v28  ;;  %1128 = vpow2.f32 %v817_v38 }
 0x203   : > { %v824_v36 = vmul.f32 -0.055555556, %v823_v31 }
 0x205   : > { %v825_v39 = vmul.f32 1.442695, %v824_v36 }
 0x207   : > { %1130 = vpow2.f32 %v825_v39 }
 0x208   : > { %1132 = vpow2.f32 %v819_v41 }
 0x20b   : > { %v1129_v47 = vpop.eup %1128 }
 0x20c   : > { %v821_v53 = vsel %vm804_vm5, %v1129_v47, 0.0 }
 0x211   : > { %v1131_v52 = vpop.eup %1130 }
 0x212   : > { %v827_v54 = vsel %vm812_vm8, %v1131_v52, 0.0  ;;  %v1133_v55 = vpop.eup %1132 }
 0x213   : > { %v828_v11 = vmul.f32 %v827_v54, %v821_v53  ;;  %v822_v57 = vsel %vm805_vm9, %v1133_v55, 0.0 }
 0x214   : > { %v829_v58 = vmul.f32 %v827_v54, %v822_v57 }
 0x215   : > { %v835_v12 = vsel %vm833_vm10, %v828_v11, 0.0 }
 0x216   : > { %v837_v60 = vadd.f32 %v835_v12, %v830_v56  ;;  %v836_v15 = vsel %vm834_vm11, %v829_v58, 0.0 }
 0x217   : > { %v838_v61 = vadd.f32 %v836_v15, %v831_v59 }
 0x218   : > { %839 = vst.msk [vmem:[#allocation2] sm:$0xff] %vm406_vm1, %v837_v60 }
 0x219   : > { %840 = vst.msk [vmem:[#allocation2 + $0x8] sm:$0xff] %vm406_vm1, %v838_v61 }
 0x21a PF:  {}
 0x21f   : > { %v841_v62 = vld [vmem:[#allocation2] sm:$0xff] }
 0x220   : > { %v842_v63 = vld [vmem:[#allocation2 + $0x8] sm:$0xff]  ;;  %v843_v32 = vmul.f32 %v841_v62, %v396_v50 }
 0x221   : > { %v844_v35 = vmul.f32 %v842_v63, %v397_v51 }
 0x222   : > { %v845_v0 = vsel %vm406_vm1, %v843_v32, 0.0 }
 0x223   : > { %v846_v1 = vsel %vm406_vm1, %v844_v35, 0.0 }
 0x224   : > { %v847_v2 = vadd.f32 %v846_v1, %v845_v0 }
 0x226   : > { %848 = vadd.xlane.f32.xlu0 %v847_v2 }
 0x2b3   : > { %v849_v3 = vpop.xlane.xlu0 %848 }
 0x2b4   : > { %v850_v4 = vrot.slane %v849_v3, 4 }
 0x2b6   : > { %v851_v5 = vadd.f32 %v850_v4, %v849_v3 }
 0x2b8   : > { %v852_v6 = vrot.slane %v851_v5, 2 }
 0x2ba   : > { %v853_v7 = vadd.f32 %v852_v6, %v851_v5 }
 0x2bc   : > { %v854_v8 = vrot.slane %v853_v7, 1 }
 0x2be   : > { %v855_v9 = vadd.f32 %v854_v8, %v853_v7 }
 0x2c0   : > { %1002 = vpush %v855_v9 }
 0x2f1   : > { %s1003_s17 = spop %1002 }
 0x2f2   : > { %v857_v48 = vstv %s1003_s17 }
 0x2f3   : > { %858 = vst.msk [vmem:[%s1747_s18] sm:$0x1] %vm337_vm0, %v857_v48 }
 0x2f4 PF: > { %s2199_s16 = sld [smem:[#allocation16_spill]]  ;;  %s2200_s0 = sld [smem:[#allocation13_spill]] }
 0x2f5   : > { %s2201_s1 = sld [smem:[#allocation14_spill]]  ;;  %s2202_s30 = sld [smem:[#allocation18_spill]] }
 0x2f6   : > { %s2203_s5 = sld [smem:[#allocation15_spill]]  ;;  %s2204_s6 = sld [smem:[#allocation17_spill]] }
 0x2fa   : > { %s28_s7 = sadd.s32 1, %s2199_s16  }
 0x2fb   : > { %p25_p3 = scmp.ge.s32.totalorder %s28_s7, 4  }
 0x2fd   :  { %27 = sbr.rel (!%p25_p3) target bundleno = 29 (0x1d), region = 119 }
 0x304   :  { %882 = vsyncpa [#allocation7], 1 }
 0x305   :  { %884 = vsyncpa [#allocation7 + $0x1], 1 }
 0x306   :  { %885 = vsyncpa [#allocation9], 1 }
 0x307   :  { %887 = vsyncpa [#allocation9 + $0x1], 1 }

</bundles_post_ra>
